<compile_context>
chip_gen: v6e
topology: v6e:2x2x1
jax: 0.10.0
libtpu: 0.0.40
codegen_flags: <defaults>
</compile_context>

<pallas_src>
import functools

import jax
import jax.numpy as jnp
from jax.experimental import pallas as pl
from jax.experimental.pallas import tpu as pltpu


def _branch_enc_rnn_kernel(xg0_ref, len_ref, wrec_ref, wih1_ref, b1_ref,
                           out_ref, *, T, B, H):
    """Fully-unrolled 2-layer LSTM recurrence (T small & static)."""
    G = 4 * H

    lens = len_ref[...]                                 # (B, 1) int32
    wrec = wrec_ref[...]                                # (2H, 8H) bf16 blockdiag
    wih1 = wih1_ref[...]                                # (H, 4H)  bf16
    b1 = jnp.broadcast_to(b1_ref[...], (B, G))          # hoisted f32 broadcast

    def lstm_gates(gates, c):
        # gate columns pre-permuted to [i | f | o | g]:
        # one sigmoid over (B, 3H) + one tanh over (B, H)  -> 2 EUP pushes.
        sig = jax.nn.sigmoid(gates[:, :3 * H])
        g = jnp.tanh(gates[:, 3 * H:])
        i, f, o = sig[:, :H], sig[:, H:2 * H], sig[:, 2 * H:3 * H]
        c_new = f * c + i * g
        h_new = o * jnp.tanh(c_new)
        return h_new, c_new

    hcat = jnp.zeros((B, 2 * H), jnp.float32)           # [h_l0 | h_l1]
    ccat = jnp.zeros((B, 2 * H), jnp.float32)           # [c_l0 | c_l1]

    # TODO(synk): for long sequences, stream xg0 over a T-chunk grid with the
    # state carried in VMEM scratch instead of full unroll (size chunks for
    # v7x's 64 MiB VMEM and set vmem_limit_bytes); if many independent
    # branches are batched, add a leading "parallel" grid axis for v7x's 2 TCs.
    for t in range(T):
        mask = t < lens                                  # (B, 1) bool

        # One block-diag recurrent matmul serves both layers:
        #   [h0|h1] @ [[whh0, 0], [0, whh1]] -> [g0_rec | g1_rec]
        rec = jnp.dot(hcat.astype(jnp.bfloat16), wrec,
                      preferred_element_type=jnp.float32)        # (B, 8H) f32

        g0 = xg0_ref[t] + rec[:, :G]
        h0n, c0n = lstm_gates(g0, ccat[:, :H])

        # inter-layer dropout is identity in eval mode
        g1 = (jnp.dot(h0n.astype(jnp.bfloat16), wih1,
                      preferred_element_type=jnp.float32)
              + rec[:, G:] + b1)
        h1n, c1n = lstm_gates(g1, ccat[:, H:])

        hn = jnp.concatenate([h0n, h1n], axis=1)
        cn = jnp.concatenate([c0n, c1n], axis=1)
        hcat = jnp.where(mask, hn, hcat)
        ccat = jnp.where(mask, cn, ccat)

    # Lane-dense (B, 4H) packed epilogue: [h_l0 | h_l1 | c_l0 | c_l1], i.e.
    # torch.cat([hidden, cell], 0).permute(1, 0, 2).reshape(B, -1).
    out_ref[...] = jnp.concatenate([hcat, ccat], axis=1)


def branch_enc_rnn(src, seq_len, params, return_in_one=False):
    """src: (T, B, input_dim) f32, seq_len: (B,) int."""
    T, B, Din = src.shape
    H = params["whh0"].shape[1]          # whh0 is (4H, H)
    G = 4 * H
    B_pad = max(8, ((B + 7) // 8) * 8)   # full 8-sublane vreg rows

    # Gate-column permutation: torch order [i, f, g, o] -> [i, f, o, g]
    perm = jnp.asarray(list(range(0, 2 * H))
                       + list(range(3 * H, 4 * H))
                       + list(range(2 * H, 3 * H)))

    # Glue (once, in JAX): fold the embedding Linear (+ eval-mode dropout
    # identity) into the layer-0 input weights; pre-transpose; fuse biases;
    # permute gate columns.  Exact only because dropout is identity in eval.
    w0 = (params["wemb"].T @ params["wih0"].T)[:, perm].astype(jnp.float32)
    b0 = (params["bemb"] @ params["wih0"].T
          + params["bih0"] + params["bhh0"])[perm].astype(jnp.float32)   # (4H,)
    whh0_t = params["whh0"].T[:, perm]                                   # (H, 4H)
    whh1_t = params["whh1"].T[:, perm]                                   # (H, 4H)
    wih1_t = params["wih1"].T[:, perm].astype(jnp.bfloat16)              # (H, 4H)
    b1 = (params["bih1"] + params["bhh1"])[perm][None, :].astype(jnp.float32)

    # Block-diagonal recurrent weight [[whh0, 0], [0, whh1]] -> (2H, 8H) bf16.
    wrec = jnp.zeros((2 * H, 8 * H), jnp.float32)
    wrec = wrec.at[:H, :G].set(whh0_t)
    wrec = wrec.at[H:, G:].set(whh1_t)
    wrec = wrec.astype(jnp.bfloat16)

    # Pad batch to B_pad (padded rows get seq_len = 0 -> stay at zero state).
    src_p = (jnp.zeros((T, B_pad, Din), jnp.float32)
             .at[:, :B, :].set(src.astype(jnp.float32)))
    lens_p = (jnp.zeros((B_pad, 1), jnp.int32)
              .at[:B, 0].set(seq_len.astype(jnp.int32)))

    # Fused layer-0 input projection, precomputed off the serial path as a
    # single plain-XLA matmul: (T*B_pad, Din) @ (Din, 4H) + b0.
    xg0 = (src_p.reshape(T * B_pad, Din) @ w0 + b0[None, :]).reshape(T, B_pad, G)

    flops = 2 * T * B_pad * (2 * H * 8 * H + H * G)
    transcendentals = T * B_pad * 2 * (3 * H + 2 * H)
    bytes_accessed = (4 * xg0.size + 2 * wrec.size + 2 * wih1_t.size
                      + 4 * b1.size + 4 * lens_p.size + 4 * B_pad * G)

    vmem = pl.BlockSpec(memory_space=pltpu.MemorySpace.VMEM)
    packed = pl.pallas_call(
        functools.partial(_branch_enc_rnn_kernel, T=T, B=B_pad, H=H),
        out_shape=jax.ShapeDtypeStruct((B_pad, G), jnp.float32),
        in_specs=[vmem] * 5,
        out_specs=vmem,
        cost_estimate=pl.CostEstimate(flops=flops,
                                      transcendentals=transcendentals,
                                      bytes_accessed=bytes_accessed),
    )(xg0, lens_p, wrec, wih1_t, b1)

    packed = packed[:B]                                  # drop padded rows
    if return_in_one:
        return packed                                    # (B, 4H)
    states = packed.reshape(B, 4, H).transpose(1, 0, 2)  # (4, B, H)
    return states[:2], states[2:]                        # hidden, cell


def _reference(src, seq_len, params):
    """Pure-JAX reference with the original (unfused) math, for validation."""
    T, B, _ = src.shape
    H = params["whh0"].shape[1]

    def cell_fn(x, h, c, wih, whh, bih, bhh):
        g = x @ wih.T + h @ whh.T + bih + bhh
        i, f, gg, o = (jax.nn.sigmoid(g[:, :H]), jax.nn.sigmoid(g[:, H:2 * H]),
                       jnp.tanh(g[:, 2 * H:3 * H]), jax.nn.sigmoid(g[:, 3 * H:]))
        c_new = f * c + i * gg
        return o * jnp.tanh(c_new), c_new

    h0 = c0 = h1 = c1 = jnp.zeros((B, H), jnp.float32)
    for t in range(T):
        x = src[t] @ params["wemb"].T + params["bemb"]
        m = (t < seq_len)[:, None]
        h0n, c0n = cell_fn(x, h0, c0, params["wih0"], params["whh0"],
                           params["bih0"], params["bhh0"])
        h0, c0 = jnp.where(m, h0n, h0), jnp.where(m, c0n, c0)
        h1n, c1n = cell_fn(h0, h1, c1, params["wih1"], params["whh1"],
                           params["bih1"], params["bhh1"])
        h1, c1 = jnp.where(m, h1n, h1), jnp.where(m, c1n, c1)
    return jnp.stack([h0, h1]), jnp.stack([c0, c1])


if __name__ == "__main__":
    # Small shapes consistent with the module.
    T, B = 8, 4
    INPUT_DIM, EMB_DIM, HIDDEN_DIM = 4, 32, 32

    key = jax.random.PRNGKey(0)
    ks = jax.random.split(key, 12)

    def init(k, shape, scale=0.1):
        return (scale * jax.random.normal(k, shape)).astype(jnp.float32)

    params = {
        "wemb": init(ks[0], (EMB_DIM, INPUT_DIM)),
        "bemb": init(ks[1], (EMB_DIM,)),
        # layer 0: input size = EMB_DIM
        "wih0": init(ks[2], (4 * HIDDEN_DIM, EMB_DIM)),
        "whh0": init(ks[3], (4 * HIDDEN_DIM, HIDDEN_DIM)),
        "bih0": init(ks[4], (4 * HIDDEN_DIM,)),
        "bhh0": init(ks[5], (4 * HIDDEN_DIM,)),
        # layer 1: input size = HIDDEN_DIM
        "wih1": init(ks[6], (4 * HIDDEN_DIM, HIDDEN_DIM)),
        "whh1": init(ks[7], (4 * HIDDEN_DIM, HIDDEN_DIM)),
        "bih1": init(ks[8], (4 * HIDDEN_DIM,)),
        "bhh1": init(ks[9], (4 * HIDDEN_DIM,)),
    }

    src = jax.random.normal(ks[10], (T, B, INPUT_DIM), dtype=jnp.float32)
    seq_len = jnp.array([8, 5, 3, 6], dtype=jnp.int32)

    # TODO(synk): dropout is implemented as eval-mode identity (no RNG mask),
    # matching module.eval(); training-mode dropout would need pltpu.prng_*
    # and would also invalidate the embed->wih0 weight fusion.
    hidden, cell = branch_enc_rnn(src, seq_len, params, return_in_one=False)
    answer = branch_enc_rnn(src, seq_len, params, return_in_one=True)
    jax.block_until_ready((hidden, cell, answer))

    ref_h, ref_c = _reference(src, seq_len, params)
    ref_answer = (jnp.concatenate([ref_h, ref_c], axis=0)
                  .transpose(1, 0, 2).reshape(B, -1))

    assert hidden.shape == (2, B, HIDDEN_DIM)
    assert cell.shape == (2, B, HIDDEN_DIM)
    assert answer.shape == (B, 4 * HIDDEN_DIM)
    # Tolerance loosened slightly for bf16 MXU operands (f32 accumulation &
    # f32 gate math retained).
    assert jnp.allclose(hidden, ref_h, atol=2e-2, rtol=2e-2), "hidden mismatch"
    assert jnp.allclose(cell, ref_c, atol=2e-2, rtol=2e-2), "cell mismatch"
    assert jnp.allclose(answer, ref_answer, atol=2e-2, rtol=2e-2), "answer mismatch"

    print("KERNEL_OK")
</pallas_src>

<mosaic_0001>
module attributes {stable_mosaic.version = 11 : i64} {
  func.func @_branch_enc_rnn_kernel(%arg0: memref<8x8x128xf32, #tpu.memory_space<vmem>>, %arg1: memref<8x1xi32, #tpu.memory_space<vmem>>, %arg2: memref<64x256xbf16, #tpu.memory_space<vmem>>, %arg3: memref<32x128xbf16, #tpu.memory_space<vmem>>, %arg4: memref<1x128xf32, #tpu.memory_space<vmem>>, %arg5: memref<8x128xf32, #tpu.memory_space<vmem>>) attributes {dimension_semantics = [], scalar_prefetch = 0 : i64, scratch_operands = 0 : i64, tpu.core_type = #tpu.core_type<tc>} {
    %c0 = arith.constant 0 : index
    %c0_0 = arith.constant 0 : index
    %0 = vector.load %arg1[%c0, %c0_0] : memref<8x1xi32, #tpu.memory_space<vmem>>, vector<8x1xi32>
    %c0_1 = arith.constant 0 : index
    %c0_2 = arith.constant 0 : index
    %1 = vector.load %arg2[%c0_1, %c0_2] : memref<64x256xbf16, #tpu.memory_space<vmem>>, vector<64x256xbf16>
    %c0_3 = arith.constant 0 : index
    %c0_4 = arith.constant 0 : index
    %2 = vector.load %arg3[%c0_3, %c0_4] : memref<32x128xbf16, #tpu.memory_space<vmem>>, vector<32x128xbf16>
    %c0_5 = arith.constant 0 : index
    %c0_6 = arith.constant 0 : index
    %3 = vector.load %arg4[%c0_5, %c0_6] : memref<1x128xf32, #tpu.memory_space<vmem>>, vector<1x128xf32>
    %4 = vector.shape_cast %3 : vector<1x128xf32> to vector<1x128xf32>
    %5 = vector.broadcast %4 : vector<1x128xf32> to vector<8x128xf32>
    %cst = arith.constant 0.000000e+00 : f32
    %6 = vector.broadcast %cst : f32 to vector<8x64xf32>
    %cst_7 = arith.constant 0.000000e+00 : f32
    %7 = vector.broadcast %cst_7 : f32 to vector<8x64xf32>
    %c0_i32 = arith.constant 0 : i32
    %8 = vector.broadcast %c0_i32 : i32 to vector<8x1xi32>
    %9 = arith.cmpi sgt, %0, %8 : vector<8x1xi32>
    %10 = arith.truncf %6 : vector<8x64xf32> to vector<8x64xbf16>
    %cst_8 = arith.constant dense<0.000000e+00> : vector<8x256xf32>
    %11 = tpu.matmul %10, %1, %cst_8 {dimension_numbers = #tpu.dot_dimension_numbers<[1], [0], [0], [1], [0, 0, 1, 1], [], []>} : vector<8x64xbf16>, vector<64x256xbf16>, vector<8x256xf32> -> vector<8x256xf32>
    %c0_9 = arith.constant 0 : index
    %c0_10 = arith.constant 0 : index
    %c0_11 = arith.constant 0 : index
    %12 = vector.load %arg0[%c0_9, %c0_10, %c0_11] : memref<8x8x128xf32, #tpu.memory_space<vmem>>, vector<1x8x128xf32>
    %13 = vector.shape_cast %12 : vector<1x8x128xf32> to vector<8x128xf32>
    %14 = vector.extract_strided_slice %11 {offsets = [0, 0], sizes = [8, 128], strides = [1, 1]} : vector<8x256xf32> to vector<8x128xf32>
    %15 = arith.addf %13, %14 : vector<8x128xf32>
    %16 = vector.extract_strided_slice %7 {offsets = [0, 0], sizes = [8, 32], strides = [1, 1]} : vector<8x64xf32> to vector<8x32xf32>
    %17 = vector.extract_strided_slice %15 {offsets = [0, 0], sizes = [8, 96], strides = [1, 1]} : vector<8x128xf32> to vector<8x96xf32>
    %18 = arith.negf %17 : vector<8x96xf32>
    %19 = math.exp %18 : vector<8x96xf32>
    %cst_12 = arith.constant 1.000000e+00 : f32
    %20 = vector.broadcast %cst_12 : f32 to vector<8x96xf32>
    %21 = arith.addf %20, %19 : vector<8x96xf32>
    %22 = arith.divf %20, %21 : vector<8x96xf32>
    %23 = vector.extract_strided_slice %15 {offsets = [0, 96], sizes = [8, 32], strides = [1, 1]} : vector<8x128xf32> to vector<8x32xf32>
    %24 = math.tanh %23 : vector<8x32xf32>
    %25 = vector.extract_strided_slice %22 {offsets = [0, 0], sizes = [8, 32], strides = [1, 1]} : vector<8x96xf32> to vector<8x32xf32>
    %26 = vector.extract_strided_slice %22 {offsets = [0, 32], sizes = [8, 32], strides = [1, 1]} : vector<8x96xf32> to vector<8x32xf32>
    %27 = vector.extract_strided_slice %22 {offsets = [0, 64], sizes = [8, 32], strides = [1, 1]} : vector<8x96xf32> to vector<8x32xf32>
    %28 = arith.mulf %26, %16 : vector<8x32xf32>
    %29 = arith.mulf %25, %24 : vector<8x32xf32>
    %30 = arith.addf %28, %29 : vector<8x32xf32>
    %31 = math.tanh %30 : vector<8x32xf32>
    %32 = arith.mulf %27, %31 : vector<8x32xf32>
    %33 = arith.truncf %32 : vector<8x32xf32> to vector<8x32xbf16>
    %cst_13 = arith.constant dense<0.000000e+00> : vector<8x128xf32>
    %34 = tpu.matmul %33, %2, %cst_13 {dimension_numbers = #tpu.dot_dimension_numbers<[1], [0], [0], [1], [0, 0, 1, 1], [], []>} : vector<8x32xbf16>, vector<32x128xbf16>, vector<8x128xf32> -> vector<8x128xf32>
    %35 = vector.extract_strided_slice %11 {offsets = [0, 128], sizes = [8, 128], strides = [1, 1]} : vector<8x256xf32> to vector<8x128xf32>
    %36 = arith.addf %34, %35 : vector<8x128xf32>
    %37 = arith.addf %36, %5 : vector<8x128xf32>
    %38 = vector.extract_strided_slice %7 {offsets = [0, 32], sizes = [8, 32], strides = [1, 1]} : vector<8x64xf32> to vector<8x32xf32>
    %39 = vector.extract_strided_slice %37 {offsets = [0, 0], sizes = [8, 96], strides = [1, 1]} : vector<8x128xf32> to vector<8x96xf32>
    %40 = arith.negf %39 : vector<8x96xf32>
    %41 = math.exp %40 : vector<8x96xf32>
    %cst_14 = arith.constant 1.000000e+00 : f32
    %42 = vector.broadcast %cst_14 : f32 to vector<8x96xf32>
    %43 = arith.addf %42, %41 : vector<8x96xf32>
    %44 = arith.divf %42, %43 : vector<8x96xf32>
    %45 = vector.extract_strided_slice %37 {offsets = [0, 96], sizes = [8, 32], strides = [1, 1]} : vector<8x128xf32> to vector<8x32xf32>
    %46 = math.tanh %45 : vector<8x32xf32>
    %47 = vector.extract_strided_slice %44 {offsets = [0, 0], sizes = [8, 32], strides = [1, 1]} : vector<8x96xf32> to vector<8x32xf32>
    %48 = vector.extract_strided_slice %44 {offsets = [0, 32], sizes = [8, 32], strides = [1, 1]} : vector<8x96xf32> to vector<8x32xf32>
    %49 = vector.extract_strided_slice %44 {offsets = [0, 64], sizes = [8, 32], strides = [1, 1]} : vector<8x96xf32> to vector<8x32xf32>
    %50 = arith.mulf %48, %38 : vector<8x32xf32>
    %51 = arith.mulf %47, %46 : vector<8x32xf32>
    %52 = arith.addf %50, %51 : vector<8x32xf32>
    %53 = math.tanh %52 : vector<8x32xf32>
    %54 = arith.mulf %49, %53 : vector<8x32xf32>
    %55 = tpu.concatenate %32, %54 in 1 : vector<8x32xf32>, vector<8x32xf32> -> vector<8x64xf32>
    %56 = tpu.concatenate %30, %52 in 1 : vector<8x32xf32>, vector<8x32xf32> -> vector<8x64xf32>
    %57 = vector.shape_cast %9 : vector<8x1xi1> to vector<8x1xi1>
    %58 = vector.broadcast %57 : vector<8x1xi1> to vector<8x64xi1>
    %59 = arith.select %58, %55, %6 : vector<8x64xi1>, vector<8x64xf32>
    %60 = vector.shape_cast %9 : vector<8x1xi1> to vector<8x1xi1>
    %61 = vector.broadcast %60 : vector<8x1xi1> to vector<8x64xi1>
    %62 = arith.select %61, %56, %7 : vector<8x64xi1>, vector<8x64xf32>
    %c1_i32 = arith.constant 1 : i32
    %63 = vector.broadcast %c1_i32 : i32 to vector<8x1xi32>
    %64 = arith.cmpi sgt, %0, %63 : vector<8x1xi32>
    %65 = arith.truncf %59 : vector<8x64xf32> to vector<8x64xbf16>
    %cst_15 = arith.constant dense<0.000000e+00> : vector<8x256xf32>
    %66 = tpu.matmul %65, %1, %cst_15 {dimension_numbers = #tpu.dot_dimension_numbers<[1], [0], [0], [1], [0, 0, 1, 1], [], []>} : vector<8x64xbf16>, vector<64x256xbf16>, vector<8x256xf32> -> vector<8x256xf32>
    %c1 = arith.constant 1 : index
    %c0_16 = arith.constant 0 : index
    %c0_17 = arith.constant 0 : index
    %67 = vector.load %arg0[%c1, %c0_16, %c0_17] : memref<8x8x128xf32, #tpu.memory_space<vmem>>, vector<1x8x128xf32>
    %68 = vector.shape_cast %67 : vector<1x8x128xf32> to vector<8x128xf32>
    %69 = vector.extract_strided_slice %66 {offsets = [0, 0], sizes = [8, 128], strides = [1, 1]} : vector<8x256xf32> to vector<8x128xf32>
    %70 = arith.addf %68, %69 : vector<8x128xf32>
    %71 = vector.extract_strided_slice %62 {offsets = [0, 0], sizes = [8, 32], strides = [1, 1]} : vector<8x64xf32> to vector<8x32xf32>
    %72 = vector.extract_strided_slice %70 {offsets = [0, 0], sizes = [8, 96], strides = [1, 1]} : vector<8x128xf32> to vector<8x96xf32>
    %73 = arith.negf %72 : vector<8x96xf32>
    %74 = math.exp %73 : vector<8x96xf32>
    %cst_18 = arith.constant 1.000000e+00 : f32
    %75 = vector.broadcast %cst_18 : f32 to vector<8x96xf32>
    %76 = arith.addf %75, %74 : vector<8x96xf32>
    %77 = arith.divf %75, %76 : vector<8x96xf32>
    %78 = vector.extract_strided_slice %70 {offsets = [0, 96], sizes = [8, 32], strides = [1, 1]} : vector<8x128xf32> to vector<8x32xf32>
    %79 = math.tanh %78 : vector<8x32xf32>
    %80 = vector.extract_strided_slice %77 {offsets = [0, 0], sizes = [8, 32], strides = [1, 1]} : vector<8x96xf32> to vector<8x32xf32>
    %81 = vector.extract_strided_slice %77 {offsets = [0, 32], sizes = [8, 32], strides = [1, 1]} : vector<8x96xf32> to vector<8x32xf32>
    %82 = vector.extract_strided_slice %77 {offsets = [0, 64], sizes = [8, 32], strides = [1, 1]} : vector<8x96xf32> to vector<8x32xf32>
    %83 = arith.mulf %81, %71 : vector<8x32xf32>
    %84 = arith.mulf %80, %79 : vector<8x32xf32>
    %85 = arith.addf %83, %84 : vector<8x32xf32>
    %86 = math.tanh %85 : vector<8x32xf32>
    %87 = arith.mulf %82, %86 : vector<8x32xf32>
    %88 = arith.truncf %87 : vector<8x32xf32> to vector<8x32xbf16>
    %cst_19 = arith.constant dense<0.000000e+00> : vector<8x128xf32>
    %89 = tpu.matmul %88, %2, %cst_19 {dimension_numbers = #tpu.dot_dimension_numbers<[1], [0], [0], [1], [0, 0, 1, 1], [], []>} : vector<8x32xbf16>, vector<32x128xbf16>, vector<8x128xf32> -> vector<8x128xf32>
    %90 = vector.extract_strided_slice %66 {offsets = [0, 128], sizes = [8, 128], strides = [1, 1]} : vector<8x256xf32> to vector<8x128xf32>
    %91 = arith.addf %89, %90 : vector<8x128xf32>
    %92 = arith.addf %91, %5 : vector<8x128xf32>
    %93 = vector.extract_strided_slice %62 {offsets = [0, 32], sizes = [8, 32], strides = [1, 1]} : vector<8x64xf32> to vector<8x32xf32>
    %94 = vector.extract_strided_slice %92 {offsets = [0, 0], sizes = [8, 96], strides = [1, 1]} : vector<8x128xf32> to vector<8x96xf32>
    %95 = arith.negf %94 : vector<8x96xf32>
    %96 = math.exp %95 : vector<8x96xf32>
    %cst_20 = arith.constant 1.000000e+00 : f32
    %97 = vector.broadcast %cst_20 : f32 to vector<8x96xf32>
    %98 = arith.addf %97, %96 : vector<8x96xf32>
    %99 = arith.divf %97, %98 : vector<8x96xf32>
    %100 = vector.extract_strided_slice %92 {offsets = [0, 96], sizes = [8, 32], strides = [1, 1]} : vector<8x128xf32> to vector<8x32xf32>
    %101 = math.tanh %100 : vector<8x32xf32>
    %102 = vector.extract_strided_slice %99 {offsets = [0, 0], sizes = [8, 32], strides = [1, 1]} : vector<8x96xf32> to vector<8x32xf32>
    %103 = vector.extract_strided_slice %99 {offsets = [0, 32], sizes = [8, 32], strides = [1, 1]} : vector<8x96xf32> to vector<8x32xf32>
    %104 = vector.extract_strided_slice %99 {offsets = [0, 64], sizes = [8, 32], strides = [1, 1]} : vector<8x96xf32> to vector<8x32xf32>
    %105 = arith.mulf %103, %93 : vector<8x32xf32>
    %106 = arith.mulf %102, %101 : vector<8x32xf32>
    %107 = arith.addf %105, %106 : vector<8x32xf32>
    %108 = math.tanh %107 : vector<8x32xf32>
    %109 = arith.mulf %104, %108 : vector<8x32xf32>
    %110 = tpu.concatenate %87, %109 in 1 : vector<8x32xf32>, vector<8x32xf32> -> vector<8x64xf32>
    %111 = tpu.concatenate %85, %107 in 1 : vector<8x32xf32>, vector<8x32xf32> -> vector<8x64xf32>
    %112 = vector.shape_cast %64 : vector<8x1xi1> to vector<8x1xi1>
    %113 = vector.broadcast %112 : vector<8x1xi1> to vector<8x64xi1>
    %114 = arith.select %113, %110, %59 : vector<8x64xi1>, vector<8x64xf32>
    %115 = vector.shape_cast %64 : vector<8x1xi1> to vector<8x1xi1>
    %116 = vector.broadcast %115 : vector<8x1xi1> to vector<8x64xi1>
    %117 = arith.select %116, %111, %62 : vector<8x64xi1>, vector<8x64xf32>
    %c2_i32 = arith.constant 2 : i32
    %118 = vector.broadcast %c2_i32 : i32 to vector<8x1xi32>
    %119 = arith.cmpi sgt, %0, %118 : vector<8x1xi32>
    %120 = arith.truncf %114 : vector<8x64xf32> to vector<8x64xbf16>
    %cst_21 = arith.constant dense<0.000000e+00> : vector<8x256xf32>
    %121 = tpu.matmul %120, %1, %cst_21 {dimension_numbers = #tpu.dot_dimension_numbers<[1], [0], [0], [1], [0, 0, 1, 1], [], []>} : vector<8x64xbf16>, vector<64x256xbf16>, vector<8x256xf32> -> vector<8x256xf32>
    %c2 = arith.constant 2 : index
    %c0_22 = arith.constant 0 : index
    %c0_23 = arith.constant 0 : index
    %122 = vector.load %arg0[%c2, %c0_22, %c0_23] : memref<8x8x128xf32, #tpu.memory_space<vmem>>, vector<1x8x128xf32>
    %123 = vector.shape_cast %122 : vector<1x8x128xf32> to vector<8x128xf32>
    %124 = vector.extract_strided_slice %121 {offsets = [0, 0], sizes = [8, 128], strides = [1, 1]} : vector<8x256xf32> to vector<8x128xf32>
    %125 = arith.addf %123, %124 : vector<8x128xf32>
    %126 = vector.extract_strided_slice %117 {offsets = [0, 0], sizes = [8, 32], strides = [1, 1]} : vector<8x64xf32> to vector<8x32xf32>
    %127 = vector.extract_strided_slice %125 {offsets = [0, 0], sizes = [8, 96], strides = [1, 1]} : vector<8x128xf32> to vector<8x96xf32>
    %128 = arith.negf %127 : vector<8x96xf32>
    %129 = math.exp %128 : vector<8x96xf32>
    %cst_24 = arith.constant 1.000000e+00 : f32
    %130 = vector.broadcast %cst_24 : f32 to vector<8x96xf32>
    %131 = arith.addf %130, %129 : vector<8x96xf32>
    %132 = arith.divf %130, %131 : vector<8x96xf32>
    %133 = vector.extract_strided_slice %125 {offsets = [0, 96], sizes = [8, 32], strides = [1, 1]} : vector<8x128xf32> to vector<8x32xf32>
    %134 = math.tanh %133 : vector<8x32xf32>
    %135 = vector.extract_strided_slice %132 {offsets = [0, 0], sizes = [8, 32], strides = [1, 1]} : vector<8x96xf32> to vector<8x32xf32>
    %136 = vector.extract_strided_slice %132 {offsets = [0, 32], sizes = [8, 32], strides = [1, 1]} : vector<8x96xf32> to vector<8x32xf32>
    %137 = vector.extract_strided_slice %132 {offsets = [0, 64], sizes = [8, 32], strides = [1, 1]} : vector<8x96xf32> to vector<8x32xf32>
    %138 = arith.mulf %136, %126 : vector<8x32xf32>
    %139 = arith.mulf %135, %134 : vector<8x32xf32>
    %140 = arith.addf %138, %139 : vector<8x32xf32>
    %141 = math.tanh %140 : vector<8x32xf32>
    %142 = arith.mulf %137, %141 : vector<8x32xf32>
    %143 = arith.truncf %142 : vector<8x32xf32> to vector<8x32xbf16>
    %cst_25 = arith.constant dense<0.000000e+00> : vector<8x128xf32>
    %144 = tpu.matmul %143, %2, %cst_25 {dimension_numbers = #tpu.dot_dimension_numbers<[1], [0], [0], [1], [0, 0, 1, 1], [], []>} : vector<8x32xbf16>, vector<32x128xbf16>, vector<8x128xf32> -> vector<8x128xf32>
    %145 = vector.extract_strided_slice %121 {offsets = [0, 128], sizes = [8, 128], strides = [1, 1]} : vector<8x256xf32> to vector<8x128xf32>
    %146 = arith.addf %144, %145 : vector<8x128xf32>
    %147 = arith.addf %146, %5 : vector<8x128xf32>
    %148 = vector.extract_strided_slice %117 {offsets = [0, 32], sizes = [8, 32], strides = [1, 1]} : vector<8x64xf32> to vector<8x32xf32>
    %149 = vector.extract_strided_slice %147 {offsets = [0, 0], sizes = [8, 96], strides = [1, 1]} : vector<8x128xf32> to vector<8x96xf32>
    %150 = arith.negf %149 : vector<8x96xf32>
    %151 = math.exp %150 : vector<8x96xf32>
    %cst_26 = arith.constant 1.000000e+00 : f32
    %152 = vector.broadcast %cst_26 : f32 to vector<8x96xf32>
    %153 = arith.addf %152, %151 : vector<8x96xf32>
    %154 = arith.divf %152, %153 : vector<8x96xf32>
    %155 = vector.extract_strided_slice %147 {offsets = [0, 96], sizes = [8, 32], strides = [1, 1]} : vector<8x128xf32> to vector<8x32xf32>
    %156 = math.tanh %155 : vector<8x32xf32>
    %157 = vector.extract_strided_slice %154 {offsets = [0, 0], sizes = [8, 32], strides = [1, 1]} : vector<8x96xf32> to vector<8x32xf32>
    %158 = vector.extract_strided_slice %154 {offsets = [0, 32], sizes = [8, 32], strides = [1, 1]} : vector<8x96xf32> to vector<8x32xf32>
    %159 = vector.extract_strided_slice %154 {offsets = [0, 64], sizes = [8, 32], strides = [1, 1]} : vector<8x96xf32> to vector<8x32xf32>
    %160 = arith.mulf %158, %148 : vector<8x32xf32>
    %161 = arith.mulf %157, %156 : vector<8x32xf32>
    %162 = arith.addf %160, %161 : vector<8x32xf32>
    %163 = math.tanh %162 : vector<8x32xf32>
    %164 = arith.mulf %159, %163 : vector<8x32xf32>
    %165 = tpu.concatenate %142, %164 in 1 : vector<8x32xf32>, vector<8x32xf32> -> vector<8x64xf32>
    %166 = tpu.concatenate %140, %162 in 1 : vector<8x32xf32>, vector<8x32xf32> -> vector<8x64xf32>
    %167 = vector.shape_cast %119 : vector<8x1xi1> to vector<8x1xi1>
    %168 = vector.broadcast %167 : vector<8x1xi1> to vector<8x64xi1>
    %169 = arith.select %168, %165, %114 : vector<8x64xi1>, vector<8x64xf32>
    %170 = vector.shape_cast %119 : vector<8x1xi1> to vector<8x1xi1>
    %171 = vector.broadcast %170 : vector<8x1xi1> to vector<8x64xi1>
    %172 = arith.select %171, %166, %117 : vector<8x64xi1>, vector<8x64xf32>
    %c3_i32 = arith.constant 3 : i32
    %173 = vector.broadcast %c3_i32 : i32 to vector<8x1xi32>
    %174 = arith.cmpi sgt, %0, %173 : vector<8x1xi32>
    %175 = arith.truncf %169 : vector<8x64xf32> to vector<8x64xbf16>
    %cst_27 = arith.constant dense<0.000000e+00> : vector<8x256xf32>
    %176 = tpu.matmul %175, %1, %cst_27 {dimension_numbers = #tpu.dot_dimension_numbers<[1], [0], [0], [1], [0, 0, 1, 1], [], []>} : vector<8x64xbf16>, vector<64x256xbf16>, vector<8x256xf32> -> vector<8x256xf32>
    %c3 = arith.constant 3 : index
    %c0_28 = arith.constant 0 : index
    %c0_29 = arith.constant 0 : index
    %177 = vector.load %arg0[%c3, %c0_28, %c0_29] : memref<8x8x128xf32, #tpu.memory_space<vmem>>, vector<1x8x128xf32>
    %178 = vector.shape_cast %177 : vector<1x8x128xf32> to vector<8x128xf32>
    %179 = vector.extract_strided_slice %176 {offsets = [0, 0], sizes = [8, 128], strides = [1, 1]} : vector<8x256xf32> to vector<8x128xf32>
    %180 = arith.addf %178, %179 : vector<8x128xf32>
    %181 = vector.extract_strided_slice %172 {offsets = [0, 0], sizes = [8, 32], strides = [1, 1]} : vector<8x64xf32> to vector<8x32xf32>
    %182 = vector.extract_strided_slice %180 {offsets = [0, 0], sizes = [8, 96], strides = [1, 1]} : vector<8x128xf32> to vector<8x96xf32>
    %183 = arith.negf %182 : vector<8x96xf32>
    %184 = math.exp %183 : vector<8x96xf32>
    %cst_30 = arith.constant 1.000000e+00 : f32
    %185 = vector.broadcast %cst_30 : f32 to vector<8x96xf32>
    %186 = arith.addf %185, %184 : vector<8x96xf32>
    %187 = arith.divf %185, %186 : vector<8x96xf32>
    %188 = vector.extract_strided_slice %180 {offsets = [0, 96], sizes = [8, 32], strides = [1, 1]} : vector<8x128xf32> to vector<8x32xf32>
    %189 = math.tanh %188 : vector<8x32xf32>
    %190 = vector.extract_strided_slice %187 {offsets = [0, 0], sizes = [8, 32], strides = [1, 1]} : vector<8x96xf32> to vector<8x32xf32>
    %191 = vector.extract_strided_slice %187 {offsets = [0, 32], sizes = [8, 32], strides = [1, 1]} : vector<8x96xf32> to vector<8x32xf32>
    %192 = vector.extract_strided_slice %187 {offsets = [0, 64], sizes = [8, 32], strides = [1, 1]} : vector<8x96xf32> to vector<8x32xf32>
    %193 = arith.mulf %191, %181 : vector<8x32xf32>
    %194 = arith.mulf %190, %189 : vector<8x32xf32>
    %195 = arith.addf %193, %194 : vector<8x32xf32>
    %196 = math.tanh %195 : vector<8x32xf32>
    %197 = arith.mulf %192, %196 : vector<8x32xf32>
    %198 = arith.truncf %197 : vector<8x32xf32> to vector<8x32xbf16>
    %cst_31 = arith.constant dense<0.000000e+00> : vector<8x128xf32>
    %199 = tpu.matmul %198, %2, %cst_31 {dimension_numbers = #tpu.dot_dimension_numbers<[1], [0], [0], [1], [0, 0, 1, 1], [], []>} : vector<8x32xbf16>, vector<32x128xbf16>, vector<8x128xf32> -> vector<8x128xf32>
    %200 = vector.extract_strided_slice %176 {offsets = [0, 128], sizes = [8, 128], strides = [1, 1]} : vector<8x256xf32> to vector<8x128xf32>
    %201 = arith.addf %199, %200 : vector<8x128xf32>
    %202 = arith.addf %201, %5 : vector<8x128xf32>
    %203 = vector.extract_strided_slice %172 {offsets = [0, 32], sizes = [8, 32], strides = [1, 1]} : vector<8x64xf32> to vector<8x32xf32>
    %204 = vector.extract_strided_slice %202 {offsets = [0, 0], sizes = [8, 96], strides = [1, 1]} : vector<8x128xf32> to vector<8x96xf32>
    %205 = arith.negf %204 : vector<8x96xf32>
    %206 = math.exp %205 : vector<8x96xf32>
    %cst_32 = arith.constant 1.000000e+00 : f32
    %207 = vector.broadcast %cst_32 : f32 to vector<8x96xf32>
    %208 = arith.addf %207, %206 : vector<8x96xf32>
    %209 = arith.divf %207, %208 : vector<8x96xf32>
    %210 = vector.extract_strided_slice %202 {offsets = [0, 96], sizes = [8, 32], strides = [1, 1]} : vector<8x128xf32> to vector<8x32xf32>
    %211 = math.tanh %210 : vector<8x32xf32>
    %212 = vector.extract_strided_slice %209 {offsets = [0, 0], sizes = [8, 32], strides = [1, 1]} : vector<8x96xf32> to vector<8x32xf32>
    %213 = vector.extract_strided_slice %209 {offsets = [0, 32], sizes = [8, 32], strides = [1, 1]} : vector<8x96xf32> to vector<8x32xf32>
    %214 = vector.extract_strided_slice %209 {offsets = [0, 64], sizes = [8, 32], strides = [1, 1]} : vector<8x96xf32> to vector<8x32xf32>
    %215 = arith.mulf %213, %203 : vector<8x32xf32>
    %216 = arith.mulf %212, %211 : vector<8x32xf32>
    %217 = arith.addf %215, %216 : vector<8x32xf32>
    %218 = math.tanh %217 : vector<8x32xf32>
    %219 = arith.mulf %214, %218 : vector<8x32xf32>
    %220 = tpu.concatenate %197, %219 in 1 : vector<8x32xf32>, vector<8x32xf32> -> vector<8x64xf32>
    %221 = tpu.concatenate %195, %217 in 1 : vector<8x32xf32>, vector<8x32xf32> -> vector<8x64xf32>
    %222 = vector.shape_cast %174 : vector<8x1xi1> to vector<8x1xi1>
    %223 = vector.broadcast %222 : vector<8x1xi1> to vector<8x64xi1>
    %224 = arith.select %223, %220, %169 : vector<8x64xi1>, vector<8x64xf32>
    %225 = vector.shape_cast %174 : vector<8x1xi1> to vector<8x1xi1>
    %226 = vector.broadcast %225 : vector<8x1xi1> to vector<8x64xi1>
    %227 = arith.select %226, %221, %172 : vector<8x64xi1>, vector<8x64xf32>
    %c4_i32 = arith.constant 4 : i32
    %228 = vector.broadcast %c4_i32 : i32 to vector<8x1xi32>
    %229 = arith.cmpi sgt, %0, %228 : vector<8x1xi32>
    %230 = arith.truncf %224 : vector<8x64xf32> to vector<8x64xbf16>
    %cst_33 = arith.constant dense<0.000000e+00> : vector<8x256xf32>
    %231 = tpu.matmul %230, %1, %cst_33 {dimension_numbers = #tpu.dot_dimension_numbers<[1], [0], [0], [1], [0, 0, 1, 1], [], []>} : vector<8x64xbf16>, vector<64x256xbf16>, vector<8x256xf32> -> vector<8x256xf32>
    %c4 = arith.constant 4 : index
    %c0_34 = arith.constant 0 : index
    %c0_35 = arith.constant 0 : index
    %232 = vector.load %arg0[%c4, %c0_34, %c0_35] : memref<8x8x128xf32, #tpu.memory_space<vmem>>, vector<1x8x128xf32>
    %233 = vector.shape_cast %232 : vector<1x8x128xf32> to vector<8x128xf32>
    %234 = vector.extract_strided_slice %231 {offsets = [0, 0], sizes = [8, 128], strides = [1, 1]} : vector<8x256xf32> to vector<8x128xf32>
    %235 = arith.addf %233, %234 : vector<8x128xf32>
    %236 = vector.extract_strided_slice %227 {offsets = [0, 0], sizes = [8, 32], strides = [1, 1]} : vector<8x64xf32> to vector<8x32xf32>
    %237 = vector.extract_strided_slice %235 {offsets = [0, 0], sizes = [8, 96], strides = [1, 1]} : vector<8x128xf32> to vector<8x96xf32>
    %238 = arith.negf %237 : vector<8x96xf32>
    %239 = math.exp %238 : vector<8x96xf32>
    %cst_36 = arith.constant 1.000000e+00 : f32
    %240 = vector.broadcast %cst_36 : f32 to vector<8x96xf32>
    %241 = arith.addf %240, %239 : vector<8x96xf32>
    %242 = arith.divf %240, %241 : vector<8x96xf32>
    %243 = vector.extract_strided_slice %235 {offsets = [0, 96], sizes = [8, 32], strides = [1, 1]} : vector<8x128xf32> to vector<8x32xf32>
    %244 = math.tanh %243 : vector<8x32xf32>
    %245 = vector.extract_strided_slice %242 {offsets = [0, 0], sizes = [8, 32], strides = [1, 1]} : vector<8x96xf32> to vector<8x32xf32>
    %246 = vector.extract_strided_slice %242 {offsets = [0, 32], sizes = [8, 32], strides = [1, 1]} : vector<8x96xf32> to vector<8x32xf32>
    %247 = vector.extract_strided_slice %242 {offsets = [0, 64], sizes = [8, 32], strides = [1, 1]} : vector<8x96xf32> to vector<8x32xf32>
    %248 = arith.mulf %246, %236 : vector<8x32xf32>
    %249 = arith.mulf %245, %244 : vector<8x32xf32>
    %250 = arith.addf %248, %249 : vector<8x32xf32>
    %251 = math.tanh %250 : vector<8x32xf32>
    %252 = arith.mulf %247, %251 : vector<8x32xf32>
    %253 = arith.truncf %252 : vector<8x32xf32> to vector<8x32xbf16>
    %cst_37 = arith.constant dense<0.000000e+00> : vector<8x128xf32>
    %254 = tpu.matmul %253, %2, %cst_37 {dimension_numbers = #tpu.dot_dimension_numbers<[1], [0], [0], [1], [0, 0, 1, 1], [], []>} : vector<8x32xbf16>, vector<32x128xbf16>, vector<8x128xf32> -> vector<8x128xf32>
    %255 = vector.extract_strided_slice %231 {offsets = [0, 128], sizes = [8, 128], strides = [1, 1]} : vector<8x256xf32> to vector<8x128xf32>
    %256 = arith.addf %254, %255 : vector<8x128xf32>
    %257 = arith.addf %256, %5 : vector<8x128xf32>
    %258 = vector.extract_strided_slice %227 {offsets = [0, 32], sizes = [8, 32], strides = [1, 1]} : vector<8x64xf32> to vector<8x32xf32>
    %259 = vector.extract_strided_slice %257 {offsets = [0, 0], sizes = [8, 96], strides = [1, 1]} : vector<8x128xf32> to vector<8x96xf32>
    %260 = arith.negf %259 : vector<8x96xf32>
    %261 = math.exp %260 : vector<8x96xf32>
    %cst_38 = arith.constant 1.000000e+00 : f32
    %262 = vector.broadcast %cst_38 : f32 to vector<8x96xf32>
    %263 = arith.addf %262, %261 : vector<8x96xf32>
    %264 = arith.divf %262, %263 : vector<8x96xf32>
    %265 = vector.extract_strided_slice %257 {offsets = [0, 96], sizes = [8, 32], strides = [1, 1]} : vector<8x128xf32> to vector<8x32xf32>
    %266 = math.tanh %265 : vector<8x32xf32>
    %267 = vector.extract_strided_slice %264 {offsets = [0, 0], sizes = [8, 32], strides = [1, 1]} : vector<8x96xf32> to vector<8x32xf32>
    %268 = vector.extract_strided_slice %264 {offsets = [0, 32], sizes = [8, 32], strides = [1, 1]} : vector<8x96xf32> to vector<8x32xf32>
    %269 = vector.extract_strided_slice %264 {offsets = [0, 64], sizes = [8, 32], strides = [1, 1]} : vector<8x96xf32> to vector<8x32xf32>
    %270 = arith.mulf %268, %258 : vector<8x32xf32>
    %271 = arith.mulf %267, %266 : vector<8x32xf32>
    %272 = arith.addf %270, %271 : vector<8x32xf32>
    %273 = math.tanh %272 : vector<8x32xf32>
    %274 = arith.mulf %269, %273 : vector<8x32xf32>
    %275 = tpu.concatenate %252, %274 in 1 : vector<8x32xf32>, vector<8x32xf32> -> vector<8x64xf32>
    %276 = tpu.concatenate %250, %272 in 1 : vector<8x32xf32>, vector<8x32xf32> -> vector<8x64xf32>
    %277 = vector.shape_cast %229 : vector<8x1xi1> to vector<8x1xi1>
    %278 = vector.broadcast %277 : vector<8x1xi1> to vector<8x64xi1>
    %279 = arith.select %278, %275, %224 : vector<8x64xi1>, vector<8x64xf32>
    %280 = vector.shape_cast %229 : vector<8x1xi1> to vector<8x1xi1>
    %281 = vector.broadcast %280 : vector<8x1xi1> to vector<8x64xi1>
    %282 = arith.select %281, %276, %227 : vector<8x64xi1>, vector<8x64xf32>
    %c5_i32 = arith.constant 5 : i32
    %283 = vector.broadcast %c5_i32 : i32 to vector<8x1xi32>
    %284 = arith.cmpi sgt, %0, %283 : vector<8x1xi32>
    %285 = arith.truncf %279 : vector<8x64xf32> to vector<8x64xbf16>
    %cst_39 = arith.constant dense<0.000000e+00> : vector<8x256xf32>
    %286 = tpu.matmul %285, %1, %cst_39 {dimension_numbers = #tpu.dot_dimension_numbers<[1], [0], [0], [1], [0, 0, 1, 1], [], []>} : vector<8x64xbf16>, vector<64x256xbf16>, vector<8x256xf32> -> vector<8x256xf32>
    %c5 = arith.constant 5 : index
    %c0_40 = arith.constant 0 : index
    %c0_41 = arith.constant 0 : index
    %287 = vector.load %arg0[%c5, %c0_40, %c0_41] : memref<8x8x128xf32, #tpu.memory_space<vmem>>, vector<1x8x128xf32>
    %288 = vector.shape_cast %287 : vector<1x8x128xf32> to vector<8x128xf32>
    %289 = vector.extract_strided_slice %286 {offsets = [0, 0], sizes = [8, 128], strides = [1, 1]} : vector<8x256xf32> to vector<8x128xf32>
    %290 = arith.addf %288, %289 : vector<8x128xf32>
    %291 = vector.extract_strided_slice %282 {offsets = [0, 0], sizes = [8, 32], strides = [1, 1]} : vector<8x64xf32> to vector<8x32xf32>
    %292 = vector.extract_strided_slice %290 {offsets = [0, 0], sizes = [8, 96], strides = [1, 1]} : vector<8x128xf32> to vector<8x96xf32>
    %293 = arith.negf %292 : vector<8x96xf32>
    %294 = math.exp %293 : vector<8x96xf32>
    %cst_42 = arith.constant 1.000000e+00 : f32
    %295 = vector.broadcast %cst_42 : f32 to vector<8x96xf32>
    %296 = arith.addf %295, %294 : vector<8x96xf32>
    %297 = arith.divf %295, %296 : vector<8x96xf32>
    %298 = vector.extract_strided_slice %290 {offsets = [0, 96], sizes = [8, 32], strides = [1, 1]} : vector<8x128xf32> to vector<8x32xf32>
    %299 = math.tanh %298 : vector<8x32xf32>
    %300 = vector.extract_strided_slice %297 {offsets = [0, 0], sizes = [8, 32], strides = [1, 1]} : vector<8x96xf32> to vector<8x32xf32>
    %301 = vector.extract_strided_slice %297 {offsets = [0, 32], sizes = [8, 32], strides = [1, 1]} : vector<8x96xf32> to vector<8x32xf32>
    %302 = vector.extract_strided_slice %297 {offsets = [0, 64], sizes = [8, 32], strides = [1, 1]} : vector<8x96xf32> to vector<8x32xf32>
    %303 = arith.mulf %301, %291 : vector<8x32xf32>
    %304 = arith.mulf %300, %299 : vector<8x32xf32>
    %305 = arith.addf %303, %304 : vector<8x32xf32>
    %306 = math.tanh %305 : vector<8x32xf32>
    %307 = arith.mulf %302, %306 : vector<8x32xf32>
    %308 = arith.truncf %307 : vector<8x32xf32> to vector<8x32xbf16>
    %cst_43 = arith.constant dense<0.000000e+00> : vector<8x128xf32>
    %309 = tpu.matmul %308, %2, %cst_43 {dimension_numbers = #tpu.dot_dimension_numbers<[1], [0], [0], [1], [0, 0, 1, 1], [], []>} : vector<8x32xbf16>, vector<32x128xbf16>, vector<8x128xf32> -> vector<8x128xf32>
    %310 = vector.extract_strided_slice %286 {offsets = [0, 128], sizes = [8, 128], strides = [1, 1]} : vector<8x256xf32> to vector<8x128xf32>
    %311 = arith.addf %309, %310 : vector<8x128xf32>
    %312 = arith.addf %311, %5 : vector<8x128xf32>
    %313 = vector.extract_strided_slice %282 {offsets = [0, 32], sizes = [8, 32], strides = [1, 1]} : vector<8x64xf32> to vector<8x32xf32>
    %314 = vector.extract_strided_slice %312 {offsets = [0, 0], sizes = [8, 96], strides = [1, 1]} : vector<8x128xf32> to vector<8x96xf32>
    %315 = arith.negf %314 : vector<8x96xf32>
    %316 = math.exp %315 : vector<8x96xf32>
    %cst_44 = arith.constant 1.000000e+00 : f32
    %317 = vector.broadcast %cst_44 : f32 to vector<8x96xf32>
    %318 = arith.addf %317, %316 : vector<8x96xf32>
    %319 = arith.divf %317, %318 : vector<8x96xf32>
    %320 = vector.extract_strided_slice %312 {offsets = [0, 96], sizes = [8, 32], strides = [1, 1]} : vector<8x128xf32> to vector<8x32xf32>
    %321 = math.tanh %320 : vector<8x32xf32>
    %322 = vector.extract_strided_slice %319 {offsets = [0, 0], sizes = [8, 32], strides = [1, 1]} : vector<8x96xf32> to vector<8x32xf32>
    %323 = vector.extract_strided_slice %319 {offsets = [0, 32], sizes = [8, 32], strides = [1, 1]} : vector<8x96xf32> to vector<8x32xf32>
    %324 = vector.extract_strided_slice %319 {offsets = [0, 64], sizes = [8, 32], strides = [1, 1]} : vector<8x96xf32> to vector<8x32xf32>
    %325 = arith.mulf %323, %313 : vector<8x32xf32>
    %326 = arith.mulf %322, %321 : vector<8x32xf32>
    %327 = arith.addf %325, %326 : vector<8x32xf32>
    %328 = math.tanh %327 : vector<8x32xf32>
    %329 = arith.mulf %324, %328 : vector<8x32xf32>
    %330 = tpu.concatenate %307, %329 in 1 : vector<8x32xf32>, vector<8x32xf32> -> vector<8x64xf32>
    %331 = tpu.concatenate %305, %327 in 1 : vector<8x32xf32>, vector<8x32xf32> -> vector<8x64xf32>
    %332 = vector.shape_cast %284 : vector<8x1xi1> to vector<8x1xi1>
    %333 = vector.broadcast %332 : vector<8x1xi1> to vector<8x64xi1>
    %334 = arith.select %333, %330, %279 : vector<8x64xi1>, vector<8x64xf32>
    %335 = vector.shape_cast %284 : vector<8x1xi1> to vector<8x1xi1>
    %336 = vector.broadcast %335 : vector<8x1xi1> to vector<8x64xi1>
    %337 = arith.select %336, %331, %282 : vector<8x64xi1>, vector<8x64xf32>
    %c6_i32 = arith.constant 6 : i32
    %338 = vector.broadcast %c6_i32 : i32 to vector<8x1xi32>
    %339 = arith.cmpi sgt, %0, %338 : vector<8x1xi32>
    %340 = arith.truncf %334 : vector<8x64xf32> to vector<8x64xbf16>
    %cst_45 = arith.constant dense<0.000000e+00> : vector<8x256xf32>
    %341 = tpu.matmul %340, %1, %cst_45 {dimension_numbers = #tpu.dot_dimension_numbers<[1], [0], [0], [1], [0, 0, 1, 1], [], []>} : vector<8x64xbf16>, vector<64x256xbf16>, vector<8x256xf32> -> vector<8x256xf32>
    %c6 = arith.constant 6 : index
    %c0_46 = arith.constant 0 : index
    %c0_47 = arith.constant 0 : index
    %342 = vector.load %arg0[%c6, %c0_46, %c0_47] : memref<8x8x128xf32, #tpu.memory_space<vmem>>, vector<1x8x128xf32>
    %343 = vector.shape_cast %342 : vector<1x8x128xf32> to vector<8x128xf32>
    %344 = vector.extract_strided_slice %341 {offsets = [0, 0], sizes = [8, 128], strides = [1, 1]} : vector<8x256xf32> to vector<8x128xf32>
    %345 = arith.addf %343, %344 : vector<8x128xf32>
    %346 = vector.extract_strided_slice %337 {offsets = [0, 0], sizes = [8, 32], strides = [1, 1]} : vector<8x64xf32> to vector<8x32xf32>
    %347 = vector.extract_strided_slice %345 {offsets = [0, 0], sizes = [8, 96], strides = [1, 1]} : vector<8x128xf32> to vector<8x96xf32>
    %348 = arith.negf %347 : vector<8x96xf32>
    %349 = math.exp %348 : vector<8x96xf32>
    %cst_48 = arith.constant 1.000000e+00 : f32
    %350 = vector.broadcast %cst_48 : f32 to vector<8x96xf32>
    %351 = arith.addf %350, %349 : vector<8x96xf32>
    %352 = arith.divf %350, %351 : vector<8x96xf32>
    %353 = vector.extract_strided_slice %345 {offsets = [0, 96], sizes = [8, 32], strides = [1, 1]} : vector<8x128xf32> to vector<8x32xf32>
    %354 = math.tanh %353 : vector<8x32xf32>
    %355 = vector.extract_strided_slice %352 {offsets = [0, 0], sizes = [8, 32], strides = [1, 1]} : vector<8x96xf32> to vector<8x32xf32>
    %356 = vector.extract_strided_slice %352 {offsets = [0, 32], sizes = [8, 32], strides = [1, 1]} : vector<8x96xf32> to vector<8x32xf32>
    %357 = vector.extract_strided_slice %352 {offsets = [0, 64], sizes = [8, 32], strides = [1, 1]} : vector<8x96xf32> to vector<8x32xf32>
    %358 = arith.mulf %356, %346 : vector<8x32xf32>
    %359 = arith.mulf %355, %354 : vector<8x32xf32>
    %360 = arith.addf %358, %359 : vector<8x32xf32>
    %361 = math.tanh %360 : vector<8x32xf32>
    %362 = arith.mulf %357, %361 : vector<8x32xf32>
    %363 = arith.truncf %362 : vector<8x32xf32> to vector<8x32xbf16>
    %cst_49 = arith.constant dense<0.000000e+00> : vector<8x128xf32>
    %364 = tpu.matmul %363, %2, %cst_49 {dimension_numbers = #tpu.dot_dimension_numbers<[1], [0], [0], [1], [0, 0, 1, 1], [], []>} : vector<8x32xbf16>, vector<32x128xbf16>, vector<8x128xf32> -> vector<8x128xf32>
    %365 = vector.extract_strided_slice %341 {offsets = [0, 128], sizes = [8, 128], strides = [1, 1]} : vector<8x256xf32> to vector<8x128xf32>
    %366 = arith.addf %364, %365 : vector<8x128xf32>
    %367 = arith.addf %366, %5 : vector<8x128xf32>
    %368 = vector.extract_strided_slice %337 {offsets = [0, 32], sizes = [8, 32], strides = [1, 1]} : vector<8x64xf32> to vector<8x32xf32>
    %369 = vector.extract_strided_slice %367 {offsets = [0, 0], sizes = [8, 96], strides = [1, 1]} : vector<8x128xf32> to vector<8x96xf32>
    %370 = arith.negf %369 : vector<8x96xf32>
    %371 = math.exp %370 : vector<8x96xf32>
    %cst_50 = arith.constant 1.000000e+00 : f32
    %372 = vector.broadcast %cst_50 : f32 to vector<8x96xf32>
    %373 = arith.addf %372, %371 : vector<8x96xf32>
    %374 = arith.divf %372, %373 : vector<8x96xf32>
    %375 = vector.extract_strided_slice %367 {offsets = [0, 96], sizes = [8, 32], strides = [1, 1]} : vector<8x128xf32> to vector<8x32xf32>
    %376 = math.tanh %375 : vector<8x32xf32>
    %377 = vector.extract_strided_slice %374 {offsets = [0, 0], sizes = [8, 32], strides = [1, 1]} : vector<8x96xf32> to vector<8x32xf32>
    %378 = vector.extract_strided_slice %374 {offsets = [0, 32], sizes = [8, 32], strides = [1, 1]} : vector<8x96xf32> to vector<8x32xf32>
    %379 = vector.extract_strided_slice %374 {offsets = [0, 64], sizes = [8, 32], strides = [1, 1]} : vector<8x96xf32> to vector<8x32xf32>
    %380 = arith.mulf %378, %368 : vector<8x32xf32>
    %381 = arith.mulf %377, %376 : vector<8x32xf32>
    %382 = arith.addf %380, %381 : vector<8x32xf32>
    %383 = math.tanh %382 : vector<8x32xf32>
    %384 = arith.mulf %379, %383 : vector<8x32xf32>
    %385 = tpu.concatenate %362, %384 in 1 : vector<8x32xf32>, vector<8x32xf32> -> vector<8x64xf32>
    %386 = tpu.concatenate %360, %382 in 1 : vector<8x32xf32>, vector<8x32xf32> -> vector<8x64xf32>
    %387 = vector.shape_cast %339 : vector<8x1xi1> to vector<8x1xi1>
    %388 = vector.broadcast %387 : vector<8x1xi1> to vector<8x64xi1>
    %389 = arith.select %388, %385, %334 : vector<8x64xi1>, vector<8x64xf32>
    %390 = vector.shape_cast %339 : vector<8x1xi1> to vector<8x1xi1>
    %391 = vector.broadcast %390 : vector<8x1xi1> to vector<8x64xi1>
    %392 = arith.select %391, %386, %337 : vector<8x64xi1>, vector<8x64xf32>
    %c7_i32 = arith.constant 7 : i32
    %393 = vector.broadcast %c7_i32 : i32 to vector<8x1xi32>
    %394 = arith.cmpi sgt, %0, %393 : vector<8x1xi32>
    %395 = arith.truncf %389 : vector<8x64xf32> to vector<8x64xbf16>
    %cst_51 = arith.constant dense<0.000000e+00> : vector<8x256xf32>
    %396 = tpu.matmul %395, %1, %cst_51 {dimension_numbers = #tpu.dot_dimension_numbers<[1], [0], [0], [1], [0, 0, 1, 1], [], []>} : vector<8x64xbf16>, vector<64x256xbf16>, vector<8x256xf32> -> vector<8x256xf32>
    %c7 = arith.constant 7 : index
    %c0_52 = arith.constant 0 : index
    %c0_53 = arith.constant 0 : index
    %397 = vector.load %arg0[%c7, %c0_52, %c0_53] : memref<8x8x128xf32, #tpu.memory_space<vmem>>, vector<1x8x128xf32>
    %398 = vector.shape_cast %397 : vector<1x8x128xf32> to vector<8x128xf32>
    %399 = vector.extract_strided_slice %396 {offsets = [0, 0], sizes = [8, 128], strides = [1, 1]} : vector<8x256xf32> to vector<8x128xf32>
    %400 = arith.addf %398, %399 : vector<8x128xf32>
    %401 = vector.extract_strided_slice %392 {offsets = [0, 0], sizes = [8, 32], strides = [1, 1]} : vector<8x64xf32> to vector<8x32xf32>
    %402 = vector.extract_strided_slice %400 {offsets = [0, 0], sizes = [8, 96], strides = [1, 1]} : vector<8x128xf32> to vector<8x96xf32>
    %403 = arith.negf %402 : vector<8x96xf32>
    %404 = math.exp %403 : vector<8x96xf32>
    %cst_54 = arith.constant 1.000000e+00 : f32
    %405 = vector.broadcast %cst_54 : f32 to vector<8x96xf32>
    %406 = arith.addf %405, %404 : vector<8x96xf32>
    %407 = arith.divf %405, %406 : vector<8x96xf32>
    %408 = vector.extract_strided_slice %400 {offsets = [0, 96], sizes = [8, 32], strides = [1, 1]} : vector<8x128xf32> to vector<8x32xf32>
    %409 = math.tanh %408 : vector<8x32xf32>
    %410 = vector.extract_strided_slice %407 {offsets = [0, 0], sizes = [8, 32], strides = [1, 1]} : vector<8x96xf32> to vector<8x32xf32>
    %411 = vector.extract_strided_slice %407 {offsets = [0, 32], sizes = [8, 32], strides = [1, 1]} : vector<8x96xf32> to vector<8x32xf32>
    %412 = vector.extract_strided_slice %407 {offsets = [0, 64], sizes = [8, 32], strides = [1, 1]} : vector<8x96xf32> to vector<8x32xf32>
    %413 = arith.mulf %411, %401 : vector<8x32xf32>
    %414 = arith.mulf %410, %409 : vector<8x32xf32>
    %415 = arith.addf %413, %414 : vector<8x32xf32>
    %416 = math.tanh %415 : vector<8x32xf32>
    %417 = arith.mulf %412, %416 : vector<8x32xf32>
    %418 = arith.truncf %417 : vector<8x32xf32> to vector<8x32xbf16>
    %cst_55 = arith.constant dense<0.000000e+00> : vector<8x128xf32>
    %419 = tpu.matmul %418, %2, %cst_55 {dimension_numbers = #tpu.dot_dimension_numbers<[1], [0], [0], [1], [0, 0, 1, 1], [], []>} : vector<8x32xbf16>, vector<32x128xbf16>, vector<8x128xf32> -> vector<8x128xf32>
    %420 = vector.extract_strided_slice %396 {offsets = [0, 128], sizes = [8, 128], strides = [1, 1]} : vector<8x256xf32> to vector<8x128xf32>
    %421 = arith.addf %419, %420 : vector<8x128xf32>
    %422 = arith.addf %421, %5 : vector<8x128xf32>
    %423 = vector.extract_strided_slice %392 {offsets = [0, 32], sizes = [8, 32], strides = [1, 1]} : vector<8x64xf32> to vector<8x32xf32>
    %424 = vector.extract_strided_slice %422 {offsets = [0, 0], sizes = [8, 96], strides = [1, 1]} : vector<8x128xf32> to vector<8x96xf32>
    %425 = arith.negf %424 : vector<8x96xf32>
    %426 = math.exp %425 : vector<8x96xf32>
    %cst_56 = arith.constant 1.000000e+00 : f32
    %427 = vector.broadcast %cst_56 : f32 to vector<8x96xf32>
    %428 = arith.addf %427, %426 : vector<8x96xf32>
    %429 = arith.divf %427, %428 : vector<8x96xf32>
    %430 = vector.extract_strided_slice %422 {offsets = [0, 96], sizes = [8, 32], strides = [1, 1]} : vector<8x128xf32> to vector<8x32xf32>
    %431 = math.tanh %430 : vector<8x32xf32>
    %432 = vector.extract_strided_slice %429 {offsets = [0, 0], sizes = [8, 32], strides = [1, 1]} : vector<8x96xf32> to vector<8x32xf32>
    %433 = vector.extract_strided_slice %429 {offsets = [0, 32], sizes = [8, 32], strides = [1, 1]} : vector<8x96xf32> to vector<8x32xf32>
    %434 = vector.extract_strided_slice %429 {offsets = [0, 64], sizes = [8, 32], strides = [1, 1]} : vector<8x96xf32> to vector<8x32xf32>
    %435 = arith.mulf %433, %423 : vector<8x32xf32>
    %436 = arith.mulf %432, %431 : vector<8x32xf32>
    %437 = arith.addf %435, %436 : vector<8x32xf32>
    %438 = math.tanh %437 : vector<8x32xf32>
    %439 = arith.mulf %434, %438 : vector<8x32xf32>
    %440 = tpu.concatenate %417, %439 in 1 : vector<8x32xf32>, vector<8x32xf32> -> vector<8x64xf32>
    %441 = tpu.concatenate %415, %437 in 1 : vector<8x32xf32>, vector<8x32xf32> -> vector<8x64xf32>
    %442 = vector.shape_cast %394 : vector<8x1xi1> to vector<8x1xi1>
    %443 = vector.broadcast %442 : vector<8x1xi1> to vector<8x64xi1>
    %444 = arith.select %443, %440, %389 : vector<8x64xi1>, vector<8x64xf32>
    %445 = vector.shape_cast %394 : vector<8x1xi1> to vector<8x1xi1>
    %446 = vector.broadcast %445 : vector<8x1xi1> to vector<8x64xi1>
    %447 = arith.select %446, %441, %392 : vector<8x64xi1>, vector<8x64xf32>
    %448 = tpu.concatenate %444, %447 in 1 : vector<8x64xf32>, vector<8x64xf32> -> vector<8x128xf32>
    %c0_57 = arith.constant 0 : index
    %c0_58 = arith.constant 0 : index
    %449 = vector.load %arg5[%c0_57, %c0_58] : memref<8x128xf32, #tpu.memory_space<vmem>>, vector<8x128xf32>
    tpu.vector_store %arg5[%c0_57, %c0_58], %448 {strides = array<i32>} : memref<8x128xf32, #tpu.memory_space<vmem>>, vector<8x128xf32>,
    return
  }
}

</mosaic_0001>

<bundles_post_ra>
// kernel: tpu_custom_call.1
= control target key start
LH: loop header
LB: loop body
LE: loop exit
PB: predicated region body
PF: predicated region fallthrough
CT: control target
= control target key end

     0   :  { %10 = vsyncpa [#allocation3], 0  ;;  %s2338_s0 = inlined_call_operand.hbm [shape: f32[8,8,128], index: 0, kind: input, shape index: {}]   ;;  %s2339_s1 = inlined_call_operand.vmem [shape: s32[8,1], index: 1, kind: input, shape index: {}]   ;;  %s2340_s2 = inlined_call_operand.hbm [shape: bf16[64,256], index: 2, kind: input, shape index: {}]   ;;  %s2341_s3 = inlined_call_operand.hbm [shape: bf16[32,128], index: 3, kind: input, shape index: {}]   ;;  %s2342_s4 = inlined_call_operand.vmem [shape: f32[1,128], index: 4, kind: input, shape index: {}]   ;;  %s2343_s5 = inlined_call_operand.hbm [shape: f32[8,128], index: 5, kind: output, shape index: {}]  }
   0x1   :  { %11 = vsyncpa [#allocation6], 0 }
   0x2   :  { %12 = vsyncpa [#allocation4], 0  ;;  %s1897_s18 = smov [#allocation5]   ;;  %s1898_s20 = smov [#allocation2]  }
   0x3   :  { %s32_s19 = sshll.u32 %s1897_s18, 4  ;;  %s18_s21 = sshll.u32 %s1898_s20, 4  ;;  %s33_s19 = int_to_ptr.vmem [resolvable:$true] %s32_s19  ;;  %s19_s21 = int_to_ptr.vmem [resolvable:$true] %s18_s21 }
   0x4   :  { %s1819_s22 = scalar_lea.vmem %s33_s19, 1024  ;;  %p1824_p1 = scmp.lt.s32.totalorder %s33_s19, %s33_s19 }
   0x5   :  { %p1820_p0 = scmp.ne.s32.totalorder %s33_s19, %s1819_s22  ;;  %p1825_p2 = scmp.lt.s32.totalorder %s1819_s22, %s1819_s22 }
   0x7   :  { %p1826_p3 = por %p1825_p2, %p1824_p1 }
   0x9   :  { %p1827_p4 = pnand %p1826_p3, %p1820_p0 }
   0xb   :  { %1830 = shalt.err (!%p1827_p4)
}
   0xc   :  { %s1899_s23 = smov 128   ;;  %s1900_s24 = smov 8  }
   0xd   :  { %38 = dma.hbm_to_vmem [thread:$0]  %s2340_s2, 1024, %s33_s19, [#allocation6], %s1899_s23, %s1899_s23, %s1900_s24  }
   0xe   :  { %s1839_s27 = scalar_lea.vmem %s19_s21, 1024  ;;  %p1844_p6 = scmp.lt.s32.totalorder %s19_s21, %s19_s21 }
   0xf   :  { %p1840_p5 = scmp.ne.s32.totalorder %s19_s21, %s1839_s27  ;;  %p1845_p7 = scmp.lt.s32.totalorder %s1839_s27, %s1839_s27 }
  0x11   :  { %p1846_p8 = por %p1845_p7, %p1844_p6 }
  0x13   :  { %p1847_p9 = pnand %p1846_p8, %p1840_p5 }
  0x15   :  { %1850 = shalt.err (!%p1847_p9)
}
  0x16   :  { %24 = dma.hbm_to_vmem [thread:$0]  %s2338_s0, 1024, %s19_s21, [#allocation3], %s1899_s23, %s1899_s23, %s1900_s24  }
  0x17   :  { %s1901_s30 = smov [#allocation7]  }
  0x18   :  { %s44_s6 = sshll.u32 %s1901_s30, 4  ;;  %s45_s6 = int_to_ptr.vmem [resolvable:$true] %s44_s6 }
  0x19   :  { %s1859_s7 = scalar_lea.vmem %s45_s6, 256  ;;  %p1864_p11 = scmp.lt.s32.totalorder %s45_s6, %s45_s6 }
  0x1a   :  { %p1860_p10 = scmp.ne.s32.totalorder %s45_s6, %s1859_s7  ;;  %p1865_p12 = scmp.lt.s32.totalorder %s1859_s7, %s1859_s7 }
  0x1c   :  { %p1866_p13 = por %p1865_p12, %p1864_p11 }
  0x1e   :  { %p1867_p0 = pnand %p1866_p13, %p1860_p10 }
  0x20   :  { %1870 = shalt.err (!%p1867_p0)
}
  0x21   :  { %s1902_s2 = smov 64   ;;  %s1903_s8 = smov 4  }
  0x22   :  { %50 = dma.hbm_to_vmem [thread:$0]  %s2341_s3, 256, %s45_s6, [#allocation6], %s1902_s2, %s1902_s2, %s1903_s8  }
  0x23   :  { %1891 = dma.done.wait [#allocation3], 1024  }
  0x24   :  { %1892 = vsyncadd [#allocation3], 4294966272 }
  0x25   :  { %1893 = dma.done.wait [#allocation6], 1280  }
  0x26   :  { %1894 = vsyncadd [#allocation6], 4294966016  ;;  %v1904_v0 = vmov 0   ;;  %v1954_v1 = vld [vmem:[#allocation5 + $0x34] ss:$8 sps:$4 sm:$0xff]   ;;  %v169_v9 = vld [vmem:[#allocation2] sm:$0xff] }
  0x27   :  { %160 = vmatprep.mubr.bf16.mxu0 %v1904_v0  ;;  %1656 = vset.pattern.permute.xlu1 %v1904_v0  ;;  %v1956_v2 = vld [vmem:[#allocation5 + $0x30] ss:$8 sps:$4 sm:$0xff]   ;;  %v1959_v3 = vld [vmem:[#allocation5 + $0x24] ss:$8 sps:$4 sm:$0xff]   ;;  %v1962_v4 = vld [vmem:[#allocation5 + $0x20] ss:$8 sps:$4 sm:$0xff]  }
  0x28   :  { %1657 = vset.pattern.permute.xlu0 %v1904_v0  ;;  %136 = vmatprep.subr.bf16.mxu0 %v1954_v1  ;;  %v1965_v5 = vld [vmem:[#allocation5 + $0x14] ss:$8 sps:$4 sm:$0xff]   ;;  %v1968_v6 = vld [vmem:[#allocation5 + $0x10] ss:$8 sps:$4 sm:$0xff]   ;;  %v1971_v7 = vld [vmem:[#allocation5 + $0x4] ss:$8 sps:$4 sm:$0xff]  }
  0x29   :  { %137 = vmatpush1.bf16.msra.mxu0 %v1956_v2  ;;  %v1974_v8 = vld [vmem:[#allocation5] ss:$8 sps:$4 sm:$0xff]   ;;  %s1905_s0 = smov 32   ;;  %v1906_v26 = vmov 0.0   ;;  %vm1907_vm0 = vmmov 0   ;;  %vm211_vm1 = vcmask 261120  }
  0x2a   :  { %138 = vmatprep.subr.bf16.mxu0 %v1959_v3  ;;  %v1984_v25 = vld [vmem:[#allocation7 + $0x8] sm:$0xff]   ;;  %1579 = vmatprep.subr.bf16.mxu1 %v1906_v26  ;;  %v1990_v27 = vld [vmem:[#allocation7] sm:$0xff]   ;;  %s1908_s14 = smov 96   ;;  %vm124_vm4 = vcmask 523264  }
  0x2b   :  { %1583 = vmatprep.mubr.msk.bf16.mxu1 %vm1907_vm0, %v1906_v26  ;;  %1580 = vmatpush3.bf16.msra.mxu1 %v1984_v25  ;;  %v2017_v33 = vld [vmem:[%s2342_s4] ss:$0 sm:$0xff] }
  0x2c   :  { %1581 = vmatprep.subr.bf16.mxu1 %v1906_v26  ;;  %v2024_v44 = vld [vmem:[%s2339_s1] sm:$0xff] }
  0x2d   :  { %139 = vmatpush1.bf16.msra.mxu0 %v1962_v4  ;;  %vm83_vm2 = vcmp.gt.s32.totalorder %v2024_v44, 0  ;;  %vm301_vm5 = vcmp.gt.s32.totalorder %v2024_v44, 1  ;;  %vm471_vm7 = vcmp.gt.s32.totalorder %v2024_v44, 2  ;;  %vm641_vm9 = vcmp.gt.s32.totalorder %v2024_v44, 3 }
  0x2e   :  { %140 = vmatprep.subr.bf16.mxu0 %v1965_v5  ;;  %v294_v48 = vsel %vm83_vm2, 1, %v1904_v0  ;;  %vm811_vm11 = vcmp.gt.s32.totalorder %v2024_v44, 4  ;;  %vm981_vm13 = vcmp.gt.s32.totalorder %v2024_v44, 5 }
  0x2f   :  { %1582 = vmatpush3.bf16.msra.mxu1 %v1990_v27 }
  0x30   :  { %314 = vmatprep.subr.bf16.mxu1 %v1954_v1 }
  0x31   :  { %141 = vmatpush1.bf16.msra.mxu0 %v1968_v6 }
  0x32   :  { %142 = vmatprep.subr.bf16.mxu0 %v1971_v7 }
  0x35   :  { %143 = vmatpush1.bf16.msra.mxu0 %v1974_v8 }
  0x36   :  { %1587 = vmatprep.subr.bf16.mxu0 %v1906_v26 }
  0x38   :  { %161 = vmatmul.mubr.bf16.vlgmr.msra.gmra.mxu0 %v1904_v0 }
  0x39   :  { %1588 = vmatpush3.bf16.msra.mxu0 %v1984_v25  ;;  %1591 = vmatprep.mubr.msk.bf16.mxu0 %vm1907_vm0, %v1906_v26 }
  0x3a   :  { %1589 = vmatprep.subr.bf16.mxu0 %v1906_v26 }
  0x3d   :  { %1590 = vmatpush3.bf16.msra.mxu0 %v1990_v27 }
  0x3e   :  { %484 = vmatprep.subr.bf16.mxu0 %v1954_v1 }
  0xf8   :  { %v162_v10 = vpop.f32.mrf.mxu0 }
  0xf9   :  { %v170_v11 = vadd.f32 %v169_v9, %v162_v10  ;;  %v348_v9 = vld [vmem:[#allocation2 + $0x8] sm:$0xff] }
  0xfa   :  { %v164_v12 = vpop.f32.mrf.mxu0 }
  0xfb   :  { %1672 = vtanh.f32 %v170_v11  ;;  %v1522_v16 = vmul.f32 -1.442695, %v170_v11 }
  0xfc   :  { %v166_v13 = vpop.f32.mrf.mxu0 }
  0xfd   :  { %1674 = vpow2.f32 %v1522_v16 }
  0xfe   :  { %v167_v14 = vpop.f32.mrf.mxu0 }
 0x108   :  { %v1673_v15 = vpop.eup %1672 }
 0x109   :  { %180 = vrot.lane.b32.xlu0 %v1673_v15, %s1905_s0 }
 0x10a   :  { %v1675_v17 = vpop.eup %1674 }
 0x10b   :  { %v174_v18 = vadd.f32 1.0, %v1675_v17 }
 0x10d   :  { %1676 = vrcp.f32 %v174_v18 }
 0x11a   :  { %v1677_v19 = vpop.eup %1676 }
 0x11b   :  { %v178_v22 = vmul.f32 0.0, %v1677_v19 }
 0x17b   :  { %v181_v20 = vpop.permute.xlu0 %180 }
 0x17c   :  { %v183_v21 = vmul.f32 %v1677_v19, %v181_v20 }
 0x17e   :  { %185 = vrot.lane.b32.xlu0 %v183_v21, %s1905_s0 }
 0x1f0   :  { %v186_v23 = vpop.permute.xlu0 %185 }
 0x1f1   :  { %v1981_v24 = vadd.f32 %v186_v23, %v178_v22 }
 0x1f3   :  { %1678 = vtanh.f32 %v1981_v24 }
 0x200   :  { %v1679_v28 = vpop.eup %1678 }
 0x201   :  { %191 = vrot.lane.b32.xlu1 %v1679_v28, %s1905_s0 }
 0x273   :  { %v192_v29 = vpop.permute.xlu1 %191 }
 0x274   :  { %v194_v30 = vmul.f32 %v1677_v19, %v192_v29 }
 0x276   :  { %v195_v31 = vpack.c.bf16 %v194_v30, %v194_v30 }
 0x278   :  { %197 = vrot.lane.b32.xlu1 %v195_v31, %s1902_s2 }
 0x2ea   :  { %v198_v32 = vpop.permute.xlu1 %197 }
 0x2eb   :  { %1584 = vmatmul.mubr.msk.bf16.vlgmr.msra.gmra.mxu1 %vm211_vm1, %v198_v32 }
 0x2ec   :  { %315 = vmatpush1.bf16.msra.mxu1 %v1956_v2  ;;  %338 = vmatprep.mubr.bf16.mxu1 %v1904_v0 }
 0x2ed   :  { %316 = vmatprep.subr.bf16.mxu1 %v1959_v3 }
 0x2f0   :  { %317 = vmatpush1.bf16.msra.mxu1 %v1962_v4 }
 0x2f1   :  { %318 = vmatprep.subr.bf16.mxu1 %v1965_v5 }
 0x2f4   :  { %319 = vmatpush1.bf16.msra.mxu1 %v1968_v6 }
 0x2f5   :  { %320 = vmatprep.subr.bf16.mxu1 %v1971_v7 }
 0x2f8   :  { %321 = vmatpush1.bf16.msra.mxu1 %v1974_v8 }
 0x2f9   :  { %1595 = vmatprep.subr.bf16.mxu1 %v1906_v26 }
 0x3ab   :  { %v249_v34 = vpop.f32.mrf.mxu1 }
 0x3ac   :  { %v250_v35 = vadd.f32 %v249_v34, %v164_v12 }
 0x3ad   :  { %v1585_v36 = vpop.f32.mrf.mxu1 }
 0x3ae   :  { %v255_v37 = vadd.f32 %v2017_v33, %v250_v35 }
 0x3af   :  { %v252_v38 = vpop.f32.mrf.mxu1 }
 0x3b0   :  { %1680 = vtanh.f32 %v255_v37  ;;  %v1526_v41 = vmul.f32 -1.442695, %v255_v37 }
 0x3b1   :  { %v1586_v39 = vpop.f32.mrf.mxu1 }
 0x3b2   :  { %1682 = vpow2.f32 %v1526_v41 }
 0x3bd   :  { %v1681_v40 = vpop.eup %1680 }
 0x3be   :  { %265 = vrot.lane.b32.xlu0 %v1681_v40, %s1905_s0 }
 0x3bf   :  { %v1683_v42 = vpop.eup %1682 }
 0x3c0   :  { %v259_v43 = vadd.f32 1.0, %v1683_v42 }
 0x3c2   :  { %1684 = vrcp.f32 %v259_v43 }
 0x3cf   :  { %v1685_v45 = vpop.eup %1684 }
 0x3d0   :  { %v263_v49 = vmul.f32 0.0, %v1685_v45 }
 0x430   :  { %v266_v46 = vpop.permute.xlu0 %265 }
 0x431   :  { %v268_v47 = vmul.f32 %v1685_v45, %v266_v46 }
 0x433   :  { %270 = vrot.lane.b32.xlu1 %v268_v47, %s1905_s0 }
 0x437   :  { %296 = vperm.xlu1 %1656, %v294_v48  }
 0x4a5   :  { %v271_v50 = vpop.permute.xlu1 %270 }
 0x4a6   :  { %v273_v51 = vadd.f32 %v271_v50, %v263_v49  ;;  %v464_v49 = vsel %vm301_vm5, 1, %v1904_v0 }
 0x4a8   :  { %1686 = vtanh.f32 %v273_v51 }
 0x4b2   :  { %v297_v56 = vpop.permute.xlu1 %296 }
 0x4b3   :  { %vm298_vm3 = vcmp.eq.s32.totalorder %v297_v56, 1 }
 0x4b5   :  { %v1687_v52 = vpop.eup %1686 }
 0x4b6   :  { %276 = vrot.lane.b32.xlu0 %v1687_v52, %s1905_s0 }
 0x4ba   :  { %281 = vrot.lane.b32.xlu0 %v194_v30, %s1902_s2 }
 0x4be   :  { %290 = vrot.lane.b32.xlu0 %v1981_v24, %s1908_s14 }
 0x528   :  { %v277_v53 = vpop.permute.xlu0 %276 }
 0x529   :  { %v279_v54 = vmul.f32 %v1685_v45, %v277_v53 }
 0x52b   :  { %285 = vrot.lane.b32.xlu1 %v279_v54, %s1908_s14 }
 0x52c   :  { %v282_v55 = vpop.permute.xlu0 %281 }
 0x530   :  { %v291_v57 = vpop.permute.xlu0 %290 }
 0x531   :  { %v293_v58 = vsel %vm211_vm1, %v291_v57, %v273_v51 }
 0x532   :  { %v2035_v59 = vsel %vm298_vm3, %v293_v58, 0.0 }
 0x533   :  { %358 = vrot.lane.b32.xlu0 %v2035_v59, %s1905_s0 }
 0x59d   :  { %v286_v60 = vpop.permute.xlu1 %285 }
 0x59e   :  { %v288_v61 = vsel %vm211_vm1, %v282_v55, %v286_v60 }
 0x59f   :  { %v2040_v62 = vsel %vm298_vm3, %v288_v61, 0.0 }
 0x5a0   :  { %v302_v63 = vpack.c.bf16 %v2040_v62, %v2040_v62 }
 0x5a2   :  { %1527 = vmatmul.mubr.msk.bf16.vlgmr.msra.gmra.mxu1 %vm124_vm4, %v302_v63 }
 0x5a3   :  { %1596 = vmatpush3.bf16.msra.mxu1 %v1984_v25  ;;  %1599 = vmatprep.mubr.msk.bf16.mxu1 %vm1907_vm0, %v1906_v26 }
 0x5a4   :  { %1597 = vmatprep.subr.bf16.mxu1 %v1906_v26 }
 0x5a5   :  { %v359_v22 = vpop.permute.xlu0 %358 }
 0x5a7   :  { %1598 = vmatpush3.bf16.msra.mxu1 %v1990_v27 }
 0x5a8   :  { %654 = vmatprep.subr.bf16.mxu1 %v1954_v1 }
 0x662   :  { %v340_v10 = vpop.f32.mrf.mxu1 }
 0x663   :  { %v349_v11 = vadd.f32 %v348_v9, %v340_v10 }
 0x664   :  { %v342_v12 = vpop.f32.mrf.mxu1 }
 0x665   :  { %1688 = vtanh.f32 %v349_v11  ;;  %v1528_v16 = vmul.f32 -1.442695, %v349_v11 }
 0x666   :  { %v344_v13 = vpop.f32.mrf.mxu1 }
 0x667   :  { %1690 = vpow2.f32 %v1528_v16 }
 0x668   :  { %v345_v14 = vpop.f32.mrf.mxu1 }
 0x672   :  { %v1689_v15 = vpop.eup %1688 }
 0x673   :  { %363 = vrot.lane.b32.xlu1 %v1689_v15, %s1905_s0 }
 0x674   :  { %v1691_v17 = vpop.eup %1690 }
 0x675   :  { %v353_v18 = vadd.f32 1.0, %v1691_v17 }
 0x677   :  { %1692 = vrcp.f32 %v353_v18 }
 0x684   :  { %v1693_v19 = vpop.eup %1692 }
 0x685   :  { %v361_v23 = vmul.f32 %v1693_v19, %v359_v22 }
 0x6e5   :  { %v364_v20 = vpop.permute.xlu1 %363 }
 0x6e6   :  { %v366_v21 = vmul.f32 %v1693_v19, %v364_v20 }
 0x6e8   :  { %368 = vrot.lane.b32.xlu1 %v366_v21, %s1905_s0 }
 0x75a   :  { %v369_v24 = vpop.permute.xlu1 %368 }
 0x75b   :  { %v371_v28 = vadd.f32 %v369_v24, %v361_v23 }
 0x75d   :  { %1694 = vtanh.f32 %v371_v28 }
 0x76a   :  { %v1695_v29 = vpop.eup %1694 }
 0x76b   :  { %374 = vrot.lane.b32.xlu0 %v1695_v29, %s1905_s0 }
 0x7dd   :  { %v375_v30 = vpop.permute.xlu0 %374 }
 0x7de   :  { %v377_v31 = vmul.f32 %v1693_v19, %v375_v30 }
 0x7e0   :  { %v378_v32 = vpack.c.bf16 %v377_v31, %v377_v31 }
 0x7e2   :  { %380 = vrot.lane.b32.xlu1 %v378_v32, %s1902_s2 }
 0x854   :  { %v381_v34 = vpop.permute.xlu1 %380 }
 0x855   :  { %1592 = vmatmul.mubr.msk.bf16.vlgmr.msra.gmra.mxu0 %vm211_vm1, %v381_v34 }
 0x856   :  { %485 = vmatpush1.bf16.msra.mxu0 %v1956_v2  ;;  %508 = vmatprep.mubr.bf16.mxu0 %v1904_v0 }
 0x857   :  { %486 = vmatprep.subr.bf16.mxu0 %v1959_v3 }
 0x85a   :  { %487 = vmatpush1.bf16.msra.mxu0 %v1962_v4 }
 0x85b   :  { %488 = vmatprep.subr.bf16.mxu0 %v1965_v5 }
 0x85e   :  { %489 = vmatpush1.bf16.msra.mxu0 %v1968_v6 }
 0x85f   :  { %490 = vmatprep.subr.bf16.mxu0 %v1971_v7 }
 0x862   :  { %491 = vmatpush1.bf16.msra.mxu0 %v1974_v8 }
 0x863   :  { %1603 = vmatprep.subr.bf16.mxu0 %v1906_v26 }
 0x915   :  { %v419_v35 = vpop.f32.mrf.mxu0 }
 0x916   :  { %v420_v36 = vadd.f32 %v419_v35, %v342_v12 }
 0x917   :  { %v1593_v37 = vpop.f32.mrf.mxu0 }
 0x918   :  { %v425_v38 = vadd.f32 %v2017_v33, %v420_v36 }
 0x919   :  { %v422_v39 = vpop.f32.mrf.mxu0 }
 0x91a   :  { %1696 = vtanh.f32 %v425_v38  ;;  %v1530_v42 = vmul.f32 -1.442695, %v425_v38 }
 0x91b   :  { %v1594_v40 = vpop.f32.mrf.mxu0 }
 0x91c   :  { %1698 = vpow2.f32 %v1530_v42 }
 0x927   :  { %v1697_v41 = vpop.eup %1696 }
 0x928   :  { %435 = vrot.lane.b32.xlu0 %v1697_v41, %s1905_s0 }
 0x929   :  { %v1699_v43 = vpop.eup %1698 }
 0x92a   :  { %v429_v45 = vadd.f32 1.0, %v1699_v43 }
 0x92c   :  { %1700 = vrcp.f32 %v429_v45 }
 0x939   :  { %v1701_v46 = vpop.eup %1700 }
 0x93a   :  { %v433_v50 = vmul.f32 %v1701_v46, %v2035_v59 }
 0x99a   :  { %v436_v47 = vpop.permute.xlu0 %435 }
 0x99b   :  { %v438_v48 = vmul.f32 %v1701_v46, %v436_v47 }
 0x99d   :  { %440 = vrot.lane.b32.xlu1 %v438_v48, %s1905_s0 }
 0x9a1   :  { %466 = vperm.xlu1 %1656, %v464_v49  }
 0xa0f   :  { %v441_v51 = vpop.permute.xlu1 %440 }
 0xa10   :  { %v443_v52 = vadd.f32 %v441_v51, %v433_v50  ;;  %v634_v50 = vsel %vm471_vm7, 1, %v1904_v0 }
 0xa12   :  { %1702 = vtanh.f32 %v443_v52 }
 0xa1c   :  { %v467_v57 = vpop.permute.xlu1 %466 }
 0xa1d   :  { %vm468_vm6 = vcmp.eq.s32.totalorder %v467_v57, 1 }
 0xa1f   :  { %v1703_v53 = vpop.eup %1702 }
 0xa20   :  { %446 = vrot.lane.b32.xlu0 %v1703_v53, %s1905_s0 }
 0xa24   :  { %451 = vrot.lane.b32.xlu0 %v377_v31, %s1902_s2 }
 0xa28   :  { %460 = vrot.lane.b32.xlu0 %v371_v28, %s1908_s14 }
 0xa92   :  { %v447_v54 = vpop.permute.xlu0 %446 }
 0xa93   :  { %v449_v55 = vmul.f32 %v1701_v46, %v447_v54 }
 0xa95   :  { %455 = vrot.lane.b32.xlu1 %v449_v55, %s1908_s14 }
 0xa96   :  { %v452_v56 = vpop.permute.xlu0 %451 }
 0xa9a   :  { %v461_v58 = vpop.permute.xlu0 %460 }
 0xa9b   :  { %v463_v60 = vsel %vm211_vm1, %v461_v58, %v443_v52 }
 0xa9c   :  { %v2077_v61 = vsel %vm468_vm6, %v463_v60, %v2035_v59  ;;  %v518_v59 = vld [vmem:[#allocation2 + $0x10] sm:$0xff] }
 0xa9d   :  { %528 = vrot.lane.b32.xlu0 %v2077_v61, %s1905_s0 }
 0xb07   :  { %v456_v63 = vpop.permute.xlu1 %455 }
 0xb08   :  { %v458_v9 = vsel %vm211_vm1, %v452_v56, %v456_v63 }
 0xb09   :  { %v2083_v10 = vsel %vm468_vm6, %v458_v9, %v2040_v62 }
 0xb0a   :  { %v472_v11 = vpack.c.bf16 %v2083_v10, %v2083_v10 }
 0xb0c   :  { %1531 = vmatmul.mubr.msk.bf16.vlgmr.msra.gmra.mxu0 %vm124_vm4, %v472_v11 }
 0xb0d   :  { %1604 = vmatpush3.bf16.msra.mxu0 %v1984_v25  ;;  %1607 = vmatprep.mubr.msk.bf16.mxu0 %vm1907_vm0, %v1906_v26 }
 0xb0e   :  { %1605 = vmatprep.subr.bf16.mxu0 %v1906_v26 }
 0xb0f   :  { %v529_v23 = vpop.permute.xlu0 %528 }
 0xb11   :  { %1606 = vmatpush3.bf16.msra.mxu0 %v1990_v27 }
 0xb12   :  { %824 = vmatprep.subr.bf16.mxu0 %v1954_v1 }
 0xbcc   :  { %v510_v12 = vpop.f32.mrf.mxu0 }
 0xbcd   :  { %v519_v62 = vadd.f32 %v518_v59, %v510_v12 }
 0xbce   :  { %v512_v13 = vpop.f32.mrf.mxu0 }
 0xbcf   :  { %1704 = vtanh.f32 %v519_v62  ;;  %v1532_v17 = vmul.f32 -1.442695, %v519_v62 }
 0xbd0   :  { %v514_v14 = vpop.f32.mrf.mxu0 }
 0xbd1   :  { %1706 = vpow2.f32 %v1532_v17 }
 0xbd2   :  { %v515_v15 = vpop.f32.mrf.mxu0 }
 0xbdc   :  { %v1705_v16 = vpop.eup %1704 }
 0xbdd   :  { %533 = vrot.lane.b32.xlu1 %v1705_v16, %s1905_s0 }
 0xbde   :  { %v1707_v18 = vpop.eup %1706 }
 0xbdf   :  { %v523_v19 = vadd.f32 1.0, %v1707_v18 }
 0xbe1   :  { %1708 = vrcp.f32 %v523_v19 }
 0xbee   :  { %v1709_v20 = vpop.eup %1708 }
 0xbef   :  { %v531_v24 = vmul.f32 %v1709_v20, %v529_v23 }
 0xc4f   :  { %v534_v21 = vpop.permute.xlu1 %533 }
 0xc50   :  { %v536_v22 = vmul.f32 %v1709_v20, %v534_v21 }
 0xc52   :  { %538 = vrot.lane.b32.xlu1 %v536_v22, %s1905_s0 }
 0xcc4   :  { %v539_v28 = vpop.permute.xlu1 %538 }
 0xcc5   :  { %v541_v29 = vadd.f32 %v539_v28, %v531_v24 }
 0xcc7   :  { %1710 = vtanh.f32 %v541_v29 }
 0xcd4   :  { %v1711_v30 = vpop.eup %1710 }
 0xcd5   :  { %544 = vrot.lane.b32.xlu0 %v1711_v30, %s1905_s0 }
 0xd47   :  { %v545_v31 = vpop.permute.xlu0 %544 }
 0xd48   :  { %v547_v32 = vmul.f32 %v1709_v20, %v545_v31 }
 0xd4a   :  { %v548_v34 = vpack.c.bf16 %v547_v32, %v547_v32 }
 0xd4c   :  { %550 = vrot.lane.b32.xlu1 %v548_v34, %s1902_s2 }
 0xdbe   :  { %v551_v35 = vpop.permute.xlu1 %550 }
 0xdbf   :  { %1600 = vmatmul.mubr.msk.bf16.vlgmr.msra.gmra.mxu1 %vm211_vm1, %v551_v35 }
 0xdc0   :  { %655 = vmatpush1.bf16.msra.mxu1 %v1956_v2  ;;  %678 = vmatprep.mubr.bf16.mxu1 %v1904_v0 }
 0xdc1   :  { %656 = vmatprep.subr.bf16.mxu1 %v1959_v3 }
 0xdc4   :  { %657 = vmatpush1.bf16.msra.mxu1 %v1962_v4 }
 0xdc5   :  { %658 = vmatprep.subr.bf16.mxu1 %v1965_v5 }
 0xdc8   :  { %659 = vmatpush1.bf16.msra.mxu1 %v1968_v6 }
 0xdc9   :  { %660 = vmatprep.subr.bf16.mxu1 %v1971_v7 }
 0xdcc   :  { %661 = vmatpush1.bf16.msra.mxu1 %v1974_v8 }
 0xdcd   :  { %1611 = vmatprep.subr.bf16.mxu1 %v1906_v26 }
 0xe7f   :  { %v589_v36 = vpop.f32.mrf.mxu1 }
 0xe80   :  { %v590_v37 = vadd.f32 %v589_v36, %v512_v13 }
 0xe81   :  { %v1601_v38 = vpop.f32.mrf.mxu1 }
 0xe82   :  { %v595_v39 = vadd.f32 %v2017_v33, %v590_v37 }
 0xe83   :  { %v592_v40 = vpop.f32.mrf.mxu1 }
 0xe84   :  { %1712 = vtanh.f32 %v595_v39  ;;  %v1534_v43 = vmul.f32 -1.442695, %v595_v39 }
 0xe85   :  { %v1602_v41 = vpop.f32.mrf.mxu1 }
 0xe86   :  { %1714 = vpow2.f32 %v1534_v43 }
 0xe91   :  { %v1713_v42 = vpop.eup %1712 }
 0xe92   :  { %605 = vrot.lane.b32.xlu0 %v1713_v42, %s1905_s0 }
 0xe93   :  { %v1715_v45 = vpop.eup %1714 }
 0xe94   :  { %v599_v46 = vadd.f32 1.0, %v1715_v45 }
 0xe96   :  { %1716 = vrcp.f32 %v599_v46 }
 0xea3   :  { %v1717_v47 = vpop.eup %1716 }
 0xea4   :  { %v603_v51 = vmul.f32 %v1717_v47, %v2077_v61 }
 0xf04   :  { %v606_v48 = vpop.permute.xlu0 %605 }
 0xf05   :  { %v608_v49 = vmul.f32 %v1717_v47, %v606_v48 }
 0xf07   :  { %610 = vrot.lane.b32.xlu1 %v608_v49, %s1905_s0 }
 0xf0b   :  { %636 = vperm.xlu1 %1656, %v634_v50  }
 0xf79   :  { %v611_v52 = vpop.permute.xlu1 %610 }
 0xf7a   :  { %v613_v53 = vadd.f32 %v611_v52, %v603_v51  ;;  %v804_v51 = vsel %vm641_vm9, 1, %v1904_v0 }
 0xf7c   :  { %1718 = vtanh.f32 %v613_v53 }
 0xf86   :  { %v637_v58 = vpop.permute.xlu1 %636 }
 0xf87   :  { %vm638_vm8 = vcmp.eq.s32.totalorder %v637_v58, 1 }
 0xf89   :  { %v1719_v54 = vpop.eup %1718 }
 0xf8a   :  { %616 = vrot.lane.b32.xlu0 %v1719_v54, %s1905_s0 }
 0xf8e   :  { %621 = vrot.lane.b32.xlu0 %v547_v32, %s1902_s2 }
 0xf92   :  { %630 = vrot.lane.b32.xlu0 %v541_v29, %s1908_s14 }
 0xffc   :  { %v617_v55 = vpop.permute.xlu0 %616 }
 0xffd   :  { %v619_v56 = vmul.f32 %v1717_v47, %v617_v55 }
 0xfff   :  { %625 = vrot.lane.b32.xlu1 %v619_v56, %s1908_s14 }
0x1000   :  { %v622_v57 = vpop.permute.xlu0 %621 }
0x1004   :  { %v631_v60 = vpop.permute.xlu0 %630 }
0x1005   :  { %v633_v63 = vsel %vm211_vm1, %v631_v60, %v613_v53 }
0x1006   :  { %v2120_v9 = vsel %vm638_vm8, %v633_v63, %v2077_v61  ;;  %v688_v61 = vld [vmem:[#allocation2 + $0x18] sm:$0xff] }
0x1007   :  { %698 = vrot.lane.b32.xlu0 %v2120_v9, %s1905_s0 }
0x1071   :  { %v626_v11 = vpop.permute.xlu1 %625 }
0x1072   :  { %v628_v59 = vsel %vm211_vm1, %v622_v57, %v626_v11 }
0x1073   :  { %v2126_v12 = vsel %vm638_vm8, %v628_v59, %v2083_v10 }
0x1074   :  { %v642_v62 = vpack.c.bf16 %v2126_v12, %v2126_v12 }
0x1076   :  { %1535 = vmatmul.mubr.msk.bf16.vlgmr.msra.gmra.mxu1 %vm124_vm4, %v642_v62 }
0x1077   :  { %1612 = vmatpush3.bf16.msra.mxu1 %v1984_v25  ;;  %1615 = vmatprep.mubr.msk.bf16.mxu1 %vm1907_vm0, %v1906_v26 }
0x1078   :  { %1613 = vmatprep.subr.bf16.mxu1 %v1906_v26 }
0x1079   :  { %v699_v24 = vpop.permute.xlu0 %698 }
0x107b   :  { %1614 = vmatpush3.bf16.msra.mxu1 %v1990_v27 }
0x107c   :  { %994 = vmatprep.subr.bf16.mxu1 %v1954_v1 }
0x1136   :  { %v680_v13 = vpop.f32.mrf.mxu1 }
0x1137   :  { %v689_v10 = vadd.f32 %v688_v61, %v680_v13 }
0x1138   :  { %v682_v14 = vpop.f32.mrf.mxu1 }
0x1139   :  { %1720 = vtanh.f32 %v689_v10  ;;  %v1536_v18 = vmul.f32 -1.442695, %v689_v10 }
0x113a   :  { %v684_v15 = vpop.f32.mrf.mxu1 }
0x113b   :  { %1722 = vpow2.f32 %v1536_v18 }
0x113c   :  { %v685_v16 = vpop.f32.mrf.mxu1 }
0x1146   :  { %v1721_v17 = vpop.eup %1720 }
0x1147   :  { %703 = vrot.lane.b32.xlu1 %v1721_v17, %s1905_s0 }
0x1148   :  { %v1723_v19 = vpop.eup %1722 }
0x1149   :  { %v693_v20 = vadd.f32 1.0, %v1723_v19 }
0x114b   :  { %1724 = vrcp.f32 %v693_v20 }
0x1158   :  { %v1725_v21 = vpop.eup %1724 }
0x1159   :  { %v701_v28 = vmul.f32 %v1725_v21, %v699_v24 }
0x11b9   :  { %v704_v22 = vpop.permute.xlu1 %703 }
0x11ba   :  { %v706_v23 = vmul.f32 %v1725_v21, %v704_v22 }
0x11bc   :  { %708 = vrot.lane.b32.xlu1 %v706_v23, %s1905_s0 }
0x122e   :  { %v709_v29 = vpop.permute.xlu1 %708 }
0x122f   :  { %v711_v30 = vadd.f32 %v709_v29, %v701_v28 }
0x1231   :  { %1726 = vtanh.f32 %v711_v30 }
0x123e   :  { %v1727_v31 = vpop.eup %1726 }
0x123f   :  { %714 = vrot.lane.b32.xlu0 %v1727_v31, %s1905_s0 }
0x12b1   :  { %v715_v32 = vpop.permute.xlu0 %714 }
0x12b2   :  { %v717_v34 = vmul.f32 %v1725_v21, %v715_v32 }
0x12b4   :  { %v718_v35 = vpack.c.bf16 %v717_v34, %v717_v34 }
0x12b6   :  { %720 = vrot.lane.b32.xlu1 %v718_v35, %s1902_s2 }
0x1328   :  { %v721_v36 = vpop.permute.xlu1 %720 }
0x1329   :  { %1608 = vmatmul.mubr.msk.bf16.vlgmr.msra.gmra.mxu0 %vm211_vm1, %v721_v36 }
0x132a   :  { %825 = vmatpush1.bf16.msra.mxu0 %v1956_v2  ;;  %848 = vmatprep.mubr.bf16.mxu0 %v1904_v0 }
0x132b   :  { %826 = vmatprep.subr.bf16.mxu0 %v1959_v3 }
0x132e   :  { %827 = vmatpush1.bf16.msra.mxu0 %v1962_v4 }
0x132f   :  { %828 = vmatprep.subr.bf16.mxu0 %v1965_v5 }
0x1332   :  { %829 = vmatpush1.bf16.msra.mxu0 %v1968_v6 }
0x1333   :  { %830 = vmatprep.subr.bf16.mxu0 %v1971_v7 }
0x1336   :  { %831 = vmatpush1.bf16.msra.mxu0 %v1974_v8 }
0x1337   :  { %1619 = vmatprep.subr.bf16.mxu0 %v1906_v26 }
0x13e9   :  { %v759_v37 = vpop.f32.mrf.mxu0 }
0x13ea   :  { %v760_v38 = vadd.f32 %v759_v37, %v682_v14 }
0x13eb   :  { %v1609_v39 = vpop.f32.mrf.mxu0 }
0x13ec   :  { %v765_v40 = vadd.f32 %v2017_v33, %v760_v38 }
0x13ed   :  { %v762_v41 = vpop.f32.mrf.mxu0 }
0x13ee   :  { %1728 = vtanh.f32 %v765_v40  ;;  %v1538_v45 = vmul.f32 -1.442695, %v765_v40 }
0x13ef   :  { %v1610_v42 = vpop.f32.mrf.mxu0 }
0x13f0   :  { %1730 = vpow2.f32 %v1538_v45 }
0x13fb   :  { %v1729_v43 = vpop.eup %1728 }
0x13fc   :  { %775 = vrot.lane.b32.xlu0 %v1729_v43, %s1905_s0 }
0x13fd   :  { %v1731_v46 = vpop.eup %1730 }
0x13fe   :  { %v769_v47 = vadd.f32 1.0, %v1731_v46 }
0x1400   :  { %1732 = vrcp.f32 %v769_v47 }
0x140d   :  { %v1733_v48 = vpop.eup %1732 }
0x140e   :  { %v773_v52 = vmul.f32 %v1733_v48, %v2120_v9 }
0x146e   :  { %v776_v49 = vpop.permute.xlu0 %775 }
0x146f   :  { %v778_v50 = vmul.f32 %v1733_v48, %v776_v49 }
0x1471   :  { %780 = vrot.lane.b32.xlu1 %v778_v50, %s1905_s0 }
0x1475   :  { %806 = vperm.xlu1 %1656, %v804_v51  }
0x14e3   :  { %v781_v53 = vpop.permute.xlu1 %780 }
0x14e4   :  { %v783_v54 = vadd.f32 %v781_v53, %v773_v52 }
0x14e6   :  { %1734 = vtanh.f32 %v783_v54 }
0x14f0   :  { %v807_v60 = vpop.permute.xlu1 %806 }
0x14f1   :  { %vm808_vm10 = vcmp.eq.s32.totalorder %v807_v60, 1 }
0x14f3   :  { %v1735_v55 = vpop.eup %1734 }
0x14f4   :  { %786 = vrot.lane.b32.xlu0 %v1735_v55, %s1905_s0 }
0x14f8   :  { %791 = vrot.lane.b32.xlu0 %v717_v34, %s1902_s2 }
0x14fc   :  { %800 = vrot.lane.b32.xlu0 %v711_v30, %s1908_s14 }
0x1566   :  { %v787_v56 = vpop.permute.xlu0 %786 }
0x1567   :  { %v789_v57 = vmul.f32 %v1733_v48, %v787_v56  ;;  %v974_v48 = vsel %vm811_vm11, 1, %v1904_v0 }
0x1569   :  { %795 = vrot.lane.b32.xlu1 %v789_v57, %s1908_s14 }
0x156a   :  { %v792_v58 = vpop.permute.xlu0 %791 }
0x156e   :  { %v801_v63 = vpop.permute.xlu0 %800 }
0x156f   :  { %v803_v11 = vsel %vm211_vm1, %v801_v63, %v783_v54 }
0x1570   :  { %v2163_v59 = vsel %vm808_vm10, %v803_v11, %v2120_v9  ;;  %v858_v9 = vld [vmem:[#allocation2 + $0x20] sm:$0xff] }
0x1571   :  { %868 = vrot.lane.b32.xlu0 %v2163_v59, %s1905_s0 }
0x15db   :  { %v796_v62 = vpop.permute.xlu1 %795 }
0x15dc   :  { %v798_v61 = vsel %vm211_vm1, %v792_v58, %v796_v62 }
0x15dd   :  { %v2169_v13 = vsel %vm808_vm10, %v798_v61, %v2126_v12 }
0x15de   :  { %v812_v10 = vpack.c.bf16 %v2169_v13, %v2169_v13 }
0x15e0   :  { %1539 = vmatmul.mubr.msk.bf16.vlgmr.msra.gmra.mxu0 %vm124_vm4, %v812_v10 }
0x15e1   :  { %1620 = vmatpush3.bf16.msra.mxu0 %v1984_v25  ;;  %1623 = vmatprep.mubr.msk.bf16.mxu0 %vm1907_vm0, %v1906_v26 }
0x15e2   :  { %1621 = vmatprep.subr.bf16.mxu0 %v1906_v26 }
0x15e3   :  { %v869_v28 = vpop.permute.xlu0 %868 }
0x15e5   :  { %1622 = vmatpush3.bf16.msra.mxu0 %v1990_v27 }
0x15e6   :  { %1164 = vmatprep.subr.bf16.mxu0 %v1954_v1 }
0x16a0   :  { %v850_v14 = vpop.f32.mrf.mxu0 }
0x16a1   :  { %v859_v12 = vadd.f32 %v858_v9, %v850_v14 }
0x16a2   :  { %v852_v15 = vpop.f32.mrf.mxu0 }
0x16a3   :  { %1736 = vtanh.f32 %v859_v12  ;;  %v1540_v19 = vmul.f32 -1.442695, %v859_v12 }
0x16a4   :  { %v854_v16 = vpop.f32.mrf.mxu0 }
0x16a5   :  { %1738 = vpow2.f32 %v1540_v19 }
0x16a6   :  { %v855_v17 = vpop.f32.mrf.mxu0 }
0x16b0   :  { %v1737_v18 = vpop.eup %1736 }
0x16b1   :  { %873 = vrot.lane.b32.xlu1 %v1737_v18, %s1905_s0 }
0x16b2   :  { %v1739_v20 = vpop.eup %1738 }
0x16b3   :  { %v863_v21 = vadd.f32 1.0, %v1739_v20 }
0x16b5   :  { %1740 = vrcp.f32 %v863_v21 }
0x16c2   :  { %v1741_v22 = vpop.eup %1740 }
0x16c3   :  { %v871_v29 = vmul.f32 %v1741_v22, %v869_v28 }
0x1723   :  { %v874_v23 = vpop.permute.xlu1 %873 }
0x1724   :  { %v876_v24 = vmul.f32 %v1741_v22, %v874_v23 }
0x1726   :  { %878 = vrot.lane.b32.xlu1 %v876_v24, %s1905_s0 }
0x1798   :  { %v879_v30 = vpop.permute.xlu1 %878 }
0x1799   :  { %v881_v31 = vadd.f32 %v879_v30, %v871_v29 }
0x179b   :  { %1742 = vtanh.f32 %v881_v31 }
0x17a8   :  { %v1743_v32 = vpop.eup %1742 }
0x17a9   :  { %884 = vrot.lane.b32.xlu0 %v1743_v32, %s1905_s0  ;;  %v2232_v32 = vld [vmem:[#allocation5 + $0x24] ss:$8 sps:$4 sm:$0xff]  }
0x181b   :  { %v885_v34 = vpop.permute.xlu0 %884 }
0x181c   :  { %v887_v35 = vmul.f32 %v1741_v22, %v885_v34  ;;  %v2235_v34 = vld [vmem:[#allocation5 + $0x20] ss:$8 sps:$4 sm:$0xff]  }
0x181e   :  { %v888_v36 = vpack.c.bf16 %v887_v35, %v887_v35 }
0x1820   :  { %890 = vrot.lane.b32.xlu1 %v888_v36, %s1902_s2 }
0x1892   :  { %v891_v37 = vpop.permute.xlu1 %890 }
0x1893   :  { %1616 = vmatmul.mubr.msk.bf16.vlgmr.msra.gmra.mxu1 %vm211_vm1, %v891_v37 }
0x1894   :  { %995 = vmatpush1.bf16.msra.mxu1 %v1956_v2  ;;  %1018 = vmatprep.mubr.bf16.mxu1 %v1904_v0 }
0x1895   :  { %996 = vmatprep.subr.bf16.mxu1 %v1959_v3 }
0x1898   :  { %997 = vmatpush1.bf16.msra.mxu1 %v1962_v4 }
0x1899   :  { %998 = vmatprep.subr.bf16.mxu1 %v1965_v5 }
0x189c   :  { %999 = vmatpush1.bf16.msra.mxu1 %v1968_v6 }
0x189d   :  { %1000 = vmatprep.subr.bf16.mxu1 %v1971_v7 }
0x18a0   :  { %1001 = vmatpush1.bf16.msra.mxu1 %v1974_v8 }
0x18a1   :  { %1627 = vmatprep.subr.bf16.mxu1 %v1906_v26 }
0x1953   :  { %v929_v38 = vpop.f32.mrf.mxu1 }
0x1954   :  { %v930_v39 = vadd.f32 %v929_v38, %v852_v15 }
0x1955   :  { %v1617_v40 = vpop.f32.mrf.mxu1 }
0x1956   :  { %v935_v2 = vadd.f32 %v2017_v33, %v930_v39 }
0x1957   :  { %v932_v41 = vpop.f32.mrf.mxu1 }
0x1958   :  { %1744 = vtanh.f32 %v935_v2  ;;  %v1542_v4 = vmul.f32 -1.442695, %v935_v2 }
0x1959   :  { %v1618_v3 = vpop.f32.mrf.mxu1 }
0x195a   :  { %1746 = vpow2.f32 %v1542_v4 }
0x1965   :  { %v1745_v42 = vpop.eup %1744 }
0x1966   :  { %945 = vrot.lane.b32.xlu0 %v1745_v42, %s1905_s0 }
0x1967   :  { %v1747_v5 = vpop.eup %1746 }
0x1968   :  { %v939_v43 = vadd.f32 1.0, %v1747_v5 }
0x196a   :  { %1748 = vrcp.f32 %v939_v43 }
0x1977   :  { %v1749_v45 = vpop.eup %1748 }
0x1978   :  { %v943_v49 = vmul.f32 %v1749_v45, %v2163_v59 }
0x19d8   :  { %v946_v46 = vpop.permute.xlu0 %945 }
0x19d9   :  { %v948_v47 = vmul.f32 %v1749_v45, %v946_v46 }
0x19db   :  { %950 = vrot.lane.b32.xlu1 %v948_v47, %s1905_s0 }
0x19df   :  { %976 = vperm.xlu1 %1656, %v974_v48  }
0x1a4d   :  { %v951_v50 = vpop.permute.xlu1 %950 }
0x1a4e   :  { %v953_v51 = vadd.f32 %v951_v50, %v943_v49 }
0x1a50   :  { %1750 = vtanh.f32 %v953_v51 }
0x1a5a   :  { %v977_v56 = vpop.permute.xlu1 %976 }
0x1a5b   :  { %vm978_vm12 = vcmp.eq.s32.totalorder %v977_v56, 1 }
0x1a5d   :  { %v1751_v52 = vpop.eup %1750 }
0x1a5e   :  { %956 = vrot.lane.b32.xlu0 %v1751_v52, %s1905_s0 }
0x1a62   :  { %961 = vrot.lane.b32.xlu0 %v887_v35, %s1902_s2  ;;  %v2238_v35 = vld [vmem:[#allocation5 + $0x14] ss:$8 sps:$4 sm:$0xff]  }
0x1a66   :  { %970 = vrot.lane.b32.xlu0 %v881_v31, %s1908_s14  ;;  %v2228_v31 = vld [vmem:[#allocation5 + $0x30] ss:$8 sps:$4 sm:$0xff]  }
0x1ad0   :  { %v957_v53 = vpop.permute.xlu0 %956 }
0x1ad1   :  { %v959_v54 = vmul.f32 %v1749_v45, %v957_v53 }
0x1ad3   :  { %965 = vrot.lane.b32.xlu1 %v959_v54, %s1908_s14 }
0x1ad4   :  { %v962_v55 = vpop.permute.xlu0 %961 }
0x1ad8   :  { %v971_v57 = vpop.permute.xlu0 %970 }
0x1ad9   :  { %v973_v58 = vsel %vm211_vm1, %v971_v57, %v953_v51  ;;  %v1804_v57 = vld [vmem:[#allocation7 + $0x8] sm:$0xff]  }
0x1ada   :  { %v2206_v60 = vsel %vm978_vm12, %v973_v58, %v2163_v59  ;;  %v1028_v59 = vld [vmem:[#allocation2 + $0x28] sm:$0xff]  ;;  %v1805_v58 = vld [vmem:[#allocation7] sm:$0xff]  }
0x1adb   :  { %1038 = vrot.lane.b32.xlu0 %v2206_v60, %s1905_s0 }
0x1b45   :  { %v966_v63 = vpop.permute.xlu1 %965 }
0x1b46   :  { %v968_v11 = vsel %vm211_vm1, %v962_v55, %v966_v63 }
0x1b47   :  { %v2212_v62 = vsel %vm978_vm12, %v968_v11, %v2169_v13 }
0x1b48   :  { %v982_v61 = vpack.c.bf16 %v2212_v62, %v2212_v62 }
0x1b4a   :  { %1543 = vmatmul.mubr.msk.bf16.vlgmr.msra.gmra.mxu1 %vm124_vm4, %v982_v61 }
0x1b4b   :  { %1628 = vmatpush3.bf16.msra.mxu1 %v1984_v25  ;;  %1631 = vmatprep.mubr.msk.bf16.mxu1 %vm1907_vm0, %v1906_v26 }
0x1b4c   :  { %1629 = vmatprep.subr.bf16.mxu1 %v1906_v26 }
0x1b4f   :  { %1630 = vmatpush3.bf16.msra.mxu1 %v1990_v27 }
0x1b50   :  { %1334 = vmatprep.subr.bf16.mxu1 %v1954_v1  ;;  %v1039_v1 = vpop.permute.xlu0 %1038 }
0x1c0a   :  { %v1020_v10 = vpop.f32.mrf.mxu1 }
0x1c0b   :  { %v1029_v13 = vadd.f32 %v1028_v59, %v1020_v10 }
0x1c0c   :  { %v1022_v9 = vpop.f32.mrf.mxu1 }
0x1c0d   :  { %1752 = vtanh.f32 %v1029_v13  ;;  %v1544_v25 = vmul.f32 -1.442695, %v1029_v13 }
0x1c0e   :  { %v1024_v14 = vpop.f32.mrf.mxu1 }
0x1c0f   :  { %1754 = vpow2.f32 %v1544_v25 }
0x1c10   :  { %v1025_v12 = vpop.f32.mrf.mxu1 }
0x1c1a   :  { %v1753_v15 = vpop.eup %1752 }
0x1c1b   :  { %1043 = vrot.lane.b32.xlu1 %v1753_v15, %s1905_s0 }
0x1c1c   :  { %v1755_v16 = vpop.eup %1754 }
0x1c1d   :  { %v1033_v17 = vadd.f32 1.0, %v1755_v16 }
0x1c1f   :  { %1756 = vrcp.f32 %v1033_v17 }
0x1c2c   :  { %v1757_v18 = vpop.eup %1756 }
0x1c2d   :  { %v1041_v20 = vmul.f32 %v1757_v18, %v1039_v1 }
0x1c8d   :  { %v1044_v19 = vpop.permute.xlu1 %1043 }
0x1c8e   :  { %v1046_v27 = vmul.f32 %v1757_v18, %v1044_v19 }
0x1c90   :  { %1048 = vrot.lane.b32.xlu1 %v1046_v27, %s1905_s0 }
0x1d02   :  { %v1049_v21 = vpop.permute.xlu1 %1048 }
0x1d03   :  { %v1051_v22 = vadd.f32 %v1049_v21, %v1041_v20 }
0x1d05   :  { %1758 = vtanh.f32 %v1051_v22 }
0x1d12   :  { %v1759_v23 = vpop.eup %1758 }
0x1d13   :  { %1054 = vrot.lane.b32.xlu0 %v1759_v23, %s1905_s0  ;;  %v1807_v23 = vld [vmem:[#allocation5 + $0x4] ss:$8 sps:$4 sm:$0xff]  }
0x1d85   :  { %v1055_v24 = vpop.permute.xlu0 %1054 }
0x1d86   :  { %v1057_v28 = vmul.f32 %v1757_v18, %v1055_v24  ;;  %v1808_v24 = vld [vmem:[#allocation5] ss:$8 sps:$4 sm:$0xff]  }
0x1d88   :  { %v1058_v29 = vpack.c.bf16 %v1057_v28, %v1057_v28 }
0x1d8a   :  { %1060 = vrot.lane.b32.xlu1 %v1058_v29, %s1902_s2 }
0x1dfc   :  { %v1061_v30 = vpop.permute.xlu1 %1060 }
0x1dfd   :  { %1624 = vmatmul.mubr.msk.bf16.vlgmr.msra.gmra.mxu0 %vm211_vm1, %v1061_v30 }
0x1dfe   :  { %1165 = vmatpush1.bf16.msra.mxu0 %v2228_v31  ;;  %1188 = vmatprep.mubr.bf16.mxu0 %v1904_v0 }
0x1dff   :  { %1166 = vmatprep.subr.bf16.mxu0 %v2232_v32 }
0x1e02   :  { %1167 = vmatpush1.bf16.msra.mxu0 %v2235_v34 }
0x1e03   :  { %1168 = vmatprep.subr.bf16.mxu0 %v2238_v35 }
0x1e06   :  { %1169 = vmatpush1.bf16.msra.mxu0 %v1968_v6 }
0x1e07   :  { %1170 = vmatprep.subr.bf16.mxu0 %v1971_v7 }
0x1e0a   :  { %1171 = vmatpush1.bf16.msra.mxu0 %v1974_v8 }
0x1e0b   :  { %1635 = vmatprep.subr.bf16.mxu0 %v1906_v26 }
0x1ebd   :  { %v1099_v36 = vpop.f32.mrf.mxu0 }
0x1ebe   :  { %v1100_v37 = vadd.f32 %v1099_v36, %v1022_v9 }
0x1ebf   :  { %v1625_v38 = vpop.f32.mrf.mxu0 }
0x1ec0   :  { %v1105_v39 = vadd.f32 %v2017_v33, %v1100_v37  ;;  %v1144_v33 = vsel %vm981_vm13, 1, %v1904_v0 }
0x1ec1   :  { %v1102_v40 = vpop.f32.mrf.mxu0 }
0x1ec2   :  { %1760 = vtanh.f32 %v1105_v39  ;;  %v1546_v3 = vmul.f32 -1.442695, %v1105_v39 }
0x1ec3   :  { %v1626_v2 = vpop.f32.mrf.mxu0 }
0x1ec4   :  { %1762 = vpow2.f32 %v1546_v3  ;;  %v2291_v3 = vld [vmem:[%s2339_s1] sm:$0xff]  ;;  %s1909_s1 = smov [#allocation8]  }
0x1ec5   :  { %vm1151_vm15 = vcmp.gt.s32.totalorder %v2291_v3, 6  ;;  %vm1321_vm2 = vcmp.gt.s32.totalorder %v2291_v3, 7 }
0x1ecf   :  { %v1761_v41 = vpop.eup %1760 }
0x1ed0   :  { %1115 = vrot.lane.b32.xlu0 %v1761_v41, %s1905_s0 }
0x1ed1   :  { %v1763_v6 = vpop.eup %1762 }
0x1ed2   :  { %v1109_v42 = vadd.f32 1.0, %v1763_v6  ;;  %v1314_v6 = vsel %vm1151_vm15, 1, %v1904_v0 }
0x1ed4   :  { %1764 = vrcp.f32 %v1109_v42 }
0x1ee1   :  { %v1765_v7 = vpop.eup %1764 }
0x1ee2   :  { %v1113_v5 = vmul.f32 %v1765_v7, %v2206_v60 }
0x1f42   :  { %v1116_v8 = vpop.permute.xlu0 %1115 }
0x1f43   :  { %v1118_v4 = vmul.f32 %v1765_v7, %v1116_v8 }
0x1f45   :  { %1120 = vrot.lane.b32.xlu1 %v1118_v4, %s1905_s0 }
0x1f49   :  { %1146 = vperm.xlu1 %1656, %v1144_v33  }
0x1fb7   :  { %v1121_v43 = vpop.permute.xlu1 %1120 }
0x1fb8   :  { %v1123_v45 = vadd.f32 %v1121_v43, %v1113_v5 }
0x1fba   :  { %1766 = vtanh.f32 %v1123_v45 }
0x1fc4   :  { %v1147_v49 = vpop.permute.xlu1 %1146 }
0x1fc5   :  { %vm1148_vm14 = vcmp.eq.s32.totalorder %v1147_v49, 1 }
0x1fc7   :  { %v1767_v46 = vpop.eup %1766 }
0x1fc8   :  { %1126 = vrot.lane.b32.xlu0 %v1767_v46, %s1905_s0 }
0x1fcc   :  { %1131 = vrot.lane.b32.xlu0 %v1057_v28, %s1902_s2 }
0x1fd0   :  { %1140 = vrot.lane.b32.xlu0 %v1051_v22, %s1908_s14  ;;  %v1806_v22 = vld [vmem:[#allocation5 + $0x10] ss:$8 sps:$4 sm:$0xff]  }
0x203a   :  { %v1127_v47 = vpop.permute.xlu0 %1126 }
0x203b   :  { %v1129_v48 = vmul.f32 %v1765_v7, %v1127_v47 }
0x203d   :  { %1135 = vrot.lane.b32.xlu1 %v1129_v48, %s1908_s14 }
0x203e   :  { %v1132_v44 = vpop.permute.xlu0 %1131 }
0x2042   :  { %v1141_v50 = vpop.permute.xlu0 %1140 }
0x2043   :  { %v1143_v51 = vsel %vm211_vm1, %v1141_v50, %v1123_v45 }
0x2044   :  { %v2257_v52 = vsel %vm1148_vm14, %v1143_v51, %v2206_v60  ;;  %v1198_v60 = vld [vmem:[#allocation2 + $0x30] sm:$0xff] }
0x2045   :  { %1208 = vrot.lane.b32.xlu0 %v2257_v52, %s1905_s0 }
0x20af   :  { %v1136_v53 = vpop.permute.xlu1 %1135 }
0x20b0   :  { %v1138_v54 = vsel %vm211_vm1, %v1132_v44, %v1136_v53  ;;  %v1368_v53 = vld [vmem:[#allocation2 + $0x38] sm:$0xff] }
0x20b1   :  { %v2263_v55 = vsel %vm1148_vm14, %v1138_v54, %v2212_v62 }
0x20b2   :  { %v1152_v56 = vpack.c.bf16 %v2263_v55, %v2263_v55 }
0x20b4   :  { %1547 = vmatmul.mubr.msk.bf16.vlgmr.msra.gmra.mxu0 %vm124_vm4, %v1152_v56 }
0x20b5   :  { %1636 = vmatpush3.bf16.msra.mxu0 %v1804_v57  ;;  %1639 = vmatprep.mubr.msk.bf16.mxu0 %vm1907_vm0, %v1906_v26 }
0x20b6   :  { %1637 = vmatprep.subr.bf16.mxu0 %v1906_v26 }
0x20b7   :  { %v1209_v25 = vpop.permute.xlu0 %1208 }
0x20b9   :  { %1638 = vmatpush3.bf16.msra.mxu0 %v1805_v58 }
0x2174   :  { %v1190_v63 = vpop.f32.mrf.mxu0 }
0x2175   :  { %v1199_v11 = vadd.f32 %v1198_v60, %v1190_v63 }
0x2176   :  { %v1192_v61 = vpop.f32.mrf.mxu0 }
0x2177   :  { %1768 = vtanh.f32 %v1199_v11  ;;  %v1548_v13 = vmul.f32 -1.442695, %v1199_v11 }
0x2178   :  { %v1194_v62 = vpop.f32.mrf.mxu0 }
0x2179   :  { %1770 = vpow2.f32 %v1548_v13 }
0x217a   :  { %v1195_v59 = vpop.f32.mrf.mxu0 }
0x2184   :  { %v1769_v10 = vpop.eup %1768 }
0x2185   :  { %1213 = vrot.lane.b32.xlu1 %v1769_v10, %s1905_s0 }
0x2186   :  { %v1771_v9 = vpop.eup %1770 }
0x2187   :  { %v1203_v14 = vadd.f32 1.0, %v1771_v9 }
0x2189   :  { %1772 = vrcp.f32 %v1203_v14 }
0x2196   :  { %v1773_v12 = vpop.eup %1772 }
0x2197   :  { %v1211_v16 = vmul.f32 %v1773_v12, %v1209_v25 }
0x21f7   :  { %v1214_v15 = vpop.permute.xlu1 %1213 }
0x21f8   :  { %v1216_v26 = vmul.f32 %v1773_v12, %v1214_v15 }
0x21fa   :  { %1218 = vrot.lane.b32.xlu1 %v1216_v26, %s1905_s0 }
0x226c   :  { %v1219_v17 = vpop.permute.xlu1 %1218 }
0x226d   :  { %v1221_v18 = vadd.f32 %v1219_v17, %v1211_v16 }
0x226f   :  { %1774 = vtanh.f32 %v1221_v18 }
0x227c   :  { %v1775_v19 = vpop.eup %1774 }
0x227d   :  { %1224 = vrot.lane.b32.xlu0 %v1775_v19, %s1905_s0 }
0x22ef   :  { %v1225_v27 = vpop.permute.xlu0 %1224 }
0x22f0   :  { %v1227_v1 = vmul.f32 %v1773_v12, %v1225_v27 }
0x22f2   :  { %v1228_v20 = vpack.c.bf16 %v1227_v1, %v1227_v1 }
0x22f4   :  { %1230 = vrot.lane.b32.xlu1 %v1228_v20, %s1902_s2 }
0x2366   :  { %v1231_v21 = vpop.permute.xlu1 %1230 }
0x2367   :  { %1632 = vmatmul.mubr.msk.bf16.vlgmr.msra.gmra.mxu1 %vm211_vm1, %v1231_v21 }
0x2368   :  { %1335 = vmatpush1.bf16.msra.mxu1 %v2228_v31  ;;  %1358 = vmatprep.mubr.bf16.mxu1 %v1904_v0  ;;  %v2284_v31 = vld [vmem:[%s2342_s4] ss:$0 sm:$0xff]  ;;  %s1503_s4 = sshll.u32 %s1909_s1, 4  ;;  %s1504_s4 = int_to_ptr.vmem [resolvable:$true] %s1503_s4 }
0x2369   :  { %1336 = vmatprep.subr.bf16.mxu1 %v2232_v32  ;;  %s1871_s19 = scalar_lea.vmem %s1504_s4, 128  ;;  %p1876_p2 = scmp.lt.s32.totalorder %s1504_s4, %s1504_s4 }
0x236a   :  { %p1872_p1 = scmp.ne.s32.totalorder %s1504_s4, %s1871_s19  ;;  %p1877_p3 = scmp.lt.s32.totalorder %s1871_s19, %s1871_s19 }
0x236c   :  { %1337 = vmatpush1.bf16.msra.mxu1 %v2235_v34  ;;  %p1878_p4 = por %p1877_p3, %p1876_p2 }
0x236d   :  { %1338 = vmatprep.subr.bf16.mxu1 %v2238_v35 }
0x236e   :  { %p1879_p5 = pnand %p1878_p4, %p1872_p1 }
0x2370   :  { %1339 = vmatpush1.bf16.msra.mxu1 %v1806_v22  ;;  %v1484_v22 = vsel %vm1321_vm2, 1, %v1904_v0 }
0x2371   :  { %1340 = vmatprep.subr.bf16.mxu1 %v1807_v23 }
0x2374   :  { %1341 = vmatpush1.bf16.msra.mxu1 %v1808_v24 }
0x2427   :  { %v1269_v28 = vpop.f32.mrf.mxu1 }
0x2428   :  { %v1270_v29 = vadd.f32 %v1269_v28, %v1192_v61 }
0x2429   :  { %v1633_v30 = vpop.f32.mrf.mxu1 }
0x242a   :  { %v1275_v32 = vadd.f32 %v2284_v31, %v1270_v29 }
0x242b   :  { %v1272_v36 = vpop.f32.mrf.mxu1 }
0x242c   :  { %1776 = vtanh.f32 %v1275_v32  ;;  %v1550_v37 = vmul.f32 -1.442695, %v1275_v32 }
0x242d   :  { %v1634_v34 = vpop.f32.mrf.mxu1 }
0x242e   :  { %1778 = vpow2.f32 %v1550_v37 }
0x2439   :  { %v1777_v35 = vpop.eup %1776 }
0x243a   :  { %1285 = vrot.lane.b32.xlu0 %v1777_v35, %s1905_s0 }
0x243b   :  { %v1779_v38 = vpop.eup %1778 }
0x243c   :  { %v1279_v39 = vadd.f32 1.0, %v1779_v38 }
0x243e   :  { %1780 = vrcp.f32 %v1279_v39 }
0x244b   :  { %v1781_v40 = vpop.eup %1780 }
0x244c   :  { %v1283_v42 = vmul.f32 %v1781_v40, %v2257_v52 }
0x24ac   :  { %v1286_v2 = vpop.permute.xlu0 %1285 }
0x24ad   :  { %v1288_v41 = vmul.f32 %v1781_v40, %v1286_v2 }
0x24af   :  { %1290 = vrot.lane.b32.xlu1 %v1288_v41, %s1905_s0 }
0x24b3   :  { %1316 = vperm.xlu1 %1656, %v1314_v6  }
0x2521   :  { %v1291_v7 = vpop.permute.xlu1 %1290 }
0x2522   :  { %v1293_v8 = vadd.f32 %v1291_v7, %v1283_v42 }
0x2524   :  { %1782 = vtanh.f32 %v1293_v8 }
0x252e   :  { %v1317_v45 = vpop.permute.xlu1 %1316 }
0x252f   :  { %vm1318_vm0 = vcmp.eq.s32.totalorder %v1317_v45, 1 }
0x2531   :  { %v1783_v4 = vpop.eup %1782 }
0x2532   :  { %1296 = vrot.lane.b32.xlu0 %v1783_v4, %s1905_s0 }
0x2536   :  { %1301 = vrot.lane.b32.xlu0 %v1227_v1, %s1902_s2 }
0x253a   :  { %1310 = vrot.lane.b32.xlu0 %v1221_v18, %s1908_s14 }
0x25a4   :  { %v1297_v33 = vpop.permute.xlu0 %1296 }
0x25a5   :  { %v1299_v5 = vmul.f32 %v1781_v40, %v1297_v33 }
0x25a7   :  { %1305 = vrot.lane.b32.xlu1 %v1299_v5, %s1908_s14 }
0x25a8   :  { %v1302_v43 = vpop.permute.xlu0 %1301 }
0x25ac   :  { %v1311_v46 = vpop.permute.xlu0 %1310 }
0x25ad   :  { %v1313_v47 = vsel %vm211_vm1, %v1311_v46, %v1293_v8 }
0x25ae   :  { %v2303_v48 = vsel %vm1318_vm0, %v1313_v47, %v2257_v52 }
0x25af   :  { %1378 = vrot.lane.b32.xlu0 %v2303_v48, %s1905_s0 }
0x2619   :  { %v1306_v44 = vpop.permute.xlu1 %1305 }
0x261a   :  { %v1308_v49 = vsel %vm211_vm1, %v1302_v43, %v1306_v44 }
0x261b   :  { %v2309_v50 = vsel %vm1318_vm0, %v1308_v49, %v2263_v55 }
0x261c   :  { %v1322_v51 = vpack.c.bf16 %v2309_v50, %v2309_v50 }
0x261e   :  { %1551 = vmatmul.mubr.msk.bf16.vlgmr.msra.gmra.mxu1 %vm124_vm4, %v1322_v51 }
0x2621   :  { %v1379_v10 = vpop.permute.xlu0 %1378 }
0x26de   :  { %v1360_v54 = vpop.f32.mrf.mxu1 }
0x26df   :  { %v1369_v56 = vadd.f32 %v1368_v53, %v1360_v54 }
0x26e0   :  { %v1362_v57 = vpop.f32.mrf.mxu1 }
0x26e1   :  { %1784 = vtanh.f32 %v1369_v56  ;;  %v1552_v63 = vmul.f32 -1.442695, %v1369_v56 }
0x26e2   :  { %v1364_v52 = vpop.f32.mrf.mxu1 }
0x26e3   :  { %1786 = vpow2.f32 %v1552_v63 }
0x26e4   :  { %v1365_v58 = vpop.f32.mrf.mxu1 }
0x26ee   :  { %v1785_v60 = vpop.eup %1784 }
0x26ef   :  { %1383 = vrot.lane.b32.xlu1 %v1785_v60, %s1905_s0 }
0x26f0   :  { %v1787_v11 = vpop.eup %1786 }
0x26f1   :  { %v1373_v55 = vadd.f32 1.0, %v1787_v11 }
0x26f3   :  { %1788 = vrcp.f32 %v1373_v55 }
0x2700   :  { %v1789_v61 = vpop.eup %1788 }
0x2701   :  { %v1381_v13 = vmul.f32 %v1789_v61, %v1379_v10 }
0x2761   :  { %v1384_v62 = vpop.permute.xlu1 %1383 }
0x2762   :  { %v1386_v59 = vmul.f32 %v1789_v61, %v1384_v62 }
0x2764   :  { %1388 = vrot.lane.b32.xlu1 %v1386_v59, %s1905_s0 }
0x27d6   :  { %v1389_v9 = vpop.permute.xlu1 %1388 }
0x27d7   :  { %v1391_v14 = vadd.f32 %v1389_v9, %v1381_v13 }
0x27d9   :  { %1790 = vtanh.f32 %v1391_v14 }
0x27e6   :  { %v1791_v12 = vpop.eup %1790 }
0x27e7   :  { %1394 = vrot.lane.b32.xlu0 %v1791_v12, %s1905_s0 }
0x2859   :  { %v1395_v15 = vpop.permute.xlu0 %1394 }
0x285a   :  { %v1397_v26 = vmul.f32 %v1789_v61, %v1395_v15 }
0x285c   :  { %v1398_v25 = vpack.c.bf16 %v1397_v26, %v1397_v26 }
0x285e   :  { %1400 = vrot.lane.b32.xlu1 %v1398_v25, %s1902_s2 }
0x28d0   :  { %v1401_v16 = vpop.permute.xlu1 %1400 }
0x28d1   :  { %1640 = vmatmul.mubr.msk.bf16.vlgmr.msra.gmra.mxu0 %vm211_vm1, %v1401_v16 }
0x2991   :  { %v1439_v17 = vpop.f32.mrf.mxu0 }
0x2992   :  { %v1440_v18 = vadd.f32 %v1439_v17, %v1362_v57 }
0x2993   :  { %v1641_v19 = vpop.f32.mrf.mxu0 }
0x2994   :  { %v1445_v27 = vadd.f32 %v2284_v31, %v1440_v18 }
0x2995   :  { %v1442_v1 = vpop.f32.mrf.mxu0 }
0x2996   :  { %1792 = vtanh.f32 %v1445_v27  ;;  %v1554_v23 = vmul.f32 -1.442695, %v1445_v27 }
0x2997   :  { %v1642_v20 = vpop.f32.mrf.mxu0 }
0x2998   :  { %1794 = vpow2.f32 %v1554_v23 }
0x29a3   :  { %v1793_v21 = vpop.eup %1792 }
0x29a4   :  { %1455 = vrot.lane.b32.xlu0 %v1793_v21, %s1905_s0 }
0x29a5   :  { %v1795_v24 = vpop.eup %1794 }
0x29a6   :  { %v1449_v28 = vadd.f32 1.0, %v1795_v24 }
0x29a8   :  { %1486 = vperm.xlu0 %1657, %v1484_v22   ;;  %1796 = vrcp.f32 %v1449_v28 }
0x29ac   :  { %1471 = vrot.lane.b32.xlu0 %v1397_v26, %s1902_s2 }
0x29b5   :  { %v1797_v29 = vpop.eup %1796 }
0x29b6   :  { %v1453_v32 = vmul.f32 %v1797_v29, %v2303_v48 }
0x2a16   :  { %v1456_v30 = vpop.permute.xlu0 %1455 }
0x2a17   :  { %v1458_v31 = vmul.f32 %v1797_v29, %v1456_v30 }
0x2a19   :  { %1460 = vrot.lane.b32.xlu1 %v1458_v31, %s1905_s0 }
0x2a23   :  { %v1487_v38 = vpop.permute.xlu0 %1486 }
0x2a24   :  { %vm1488_vm3 = vcmp.eq.s32.totalorder %v1487_v38, 1 }
0x2a27   :  { %v1472_v41 = vpop.permute.xlu0 %1471 }
0x2a8b   :  { %v1461_v36 = vpop.permute.xlu1 %1460 }
0x2a8c   :  { %v1463_v34 = vadd.f32 %v1461_v36, %v1453_v32 }
0x2a8e   :  { %1798 = vtanh.f32 %v1463_v34 }
0x2a9b   :  { %v1799_v35 = vpop.eup %1798 }
0x2a9c   :  { %1466 = vrot.lane.b32.xlu1 %v1799_v35, %s1905_s0 }
0x2aa0   :  { %1480 = vrot.lane.b32.xlu1 %v1391_v14, %s1908_s14 }
0x2b0e   :  { %v1467_v0 = vpop.permute.xlu1 %1466 }
0x2b0f   :  { %v1469_v37 = vmul.f32 %v1797_v29, %v1467_v0 }
0x2b11   :  { %1475 = vrot.lane.b32.xlu1 %v1469_v37, %s1908_s14 }
0x2b12   :  { %v1481_v39 = vpop.permute.xlu1 %1480 }
0x2b13   :  { %v1483_v40 = vsel %vm211_vm1, %v1481_v39, %v1463_v34 }
0x2b14   :  { %v1490_v2 = vsel %vm1488_vm3, %v1483_v40, %v2303_v48 }
0x2b15   :  { %1492 = vrot.lane.b32.xlu0 %v1490_v2, %s1902_s2 }
0x2b83   :  { %v1476_v3 = vpop.permute.xlu1 %1475 }
0x2b84   :  { %v1478_v6 = vsel %vm211_vm1, %v1472_v41, %v1476_v3 }
0x2b85   :  { %v1489_v7 = vsel %vm1488_vm3, %v1478_v6, %v2309_v50 }
0x2b87   :  { %v1493_v42 = vpop.permute.xlu0 %1492 }
0x2b88   :  { %v1495_v8 = vsel %vm124_vm4, %v1489_v7, %v1493_v42 }
0x2b89   :  { %1496 = vst [vmem:[#allocation8] sm:$0xff] %v1495_v8 }
0x2b8a   :  { %1882 = shalt.err (!%p1879_p5)
}
0x2b8b   :  { %1506 = dma.vmem_to_hbm [thread:$0]  %s1504_s4, 128, %s2343_s5, [#allocation4]  }
0x2b8c   :  { %1895 = dma.done.wait [#allocation4], 128  }
0x2b8d   :  { %1896 = vsyncadd [#allocation4], 4294967168 }
0x2b8e   :  { %1510 = vsyncpa [#allocation3], 1 }
0x2b8f   :  { %1511 = vsyncpa [#allocation6], 1 }
0x2b90   :  { %1512 = vsyncpa [#allocation4], 1 }

</bundles_post_ra>
